<compile_context>
chip_gen: v6e
topology: v6e:2x2x1
jax: 0.10.0
libtpu: 0.0.40
codegen_flags: <defaults>
</compile_context>

<pallas_src>
import functools

import jax
import jax.numpy as jnp
import numpy as np
from jax.experimental import pallas as pl
from jax.experimental.pallas import tpu as pltpu


def _layer_norm(x, gamma, beta, eps=1e-6):
    # PyTorch LayerNorm: biased variance over the last dim, eps=1e-6.
    mu = jnp.mean(x, axis=-1, keepdims=True)
    var = jnp.mean(jnp.square(x - mu), axis=-1, keepdims=True)
    return (x - mu) * jax.lax.rsqrt(var + eps) * gamma + beta


def transformer_block_kernel(
    x_q_ref,                      # (1, tq, D) f32   query tile / residual
    x_kv_ref,                     # (1, S, D)  bf16  full sequence (K/V source)
    mask_ref,                     # (1, tq, S) f32   additive mask tile
    wq_ref, wk_ref, wv_ref, wo_ref,   # (D, D) bf16 (wq pre-scaled by 1/sqrt(d_k))
    w1_ref, b1_ref, w2_ref, b2_ref,   # FFN: bf16 weights, f32 biases
    g1_ref, be1_ref, g2_ref, be2_ref,  # LayerNorm params, f32
    out_ref,                      # (1, tq, D)
    k_sc, v_sc,                   # VMEM scratch: (H, S, d_k) bf16 each
    *, n_heads):

    d_k = k_sc.shape[-1]

    # ---- project K / V once per batch element (first query tile only) ------
    # Full-width (S, D) x (D, D) matmuls; head slices written to scratch.
    @pl.when(pl.program_id(1) == 0)
    def _():
        xkv = x_kv_ref[0]                                       # (S, D) bf16
        k_full = jnp.dot(xkv, wk_ref[...],
                         preferred_element_type=jnp.float32).astype(jnp.bfloat16)
        v_full = jnp.dot(xkv, wv_ref[...],
                         preferred_element_type=jnp.float32).astype(jnp.bfloat16)
        for h in range(n_heads):                                # static slices
            k_sc[h] = k_full[:, h * d_k:(h + 1) * d_k]
            v_sc[h] = v_full[:, h * d_k:(h + 1) * d_k]

    x = x_q_ref[0]                                              # (tq, D) f32 residual
    xq = x.astype(jnp.bfloat16)
    mask = mask_ref[0]                                          # (tq, S) f32 additive

    # ---- multi-head attention ----------------------------------------------
    # One full-width Q projection (scale already folded into Wq).
    q_full = jnp.dot(xq, wq_ref[...],
                     preferred_element_type=jnp.float32)        # (tq, D) f32

    ctx_parts = []
    for h in range(n_heads):
        qh = q_full[:, h * d_k:(h + 1) * d_k].astype(jnp.bfloat16)   # (tq, d_k)
        # q . k^T contracting d_k (NT dot — no explicit transpose / relayout).
        s = jax.lax.dot_general(qh, k_sc[h], (((1,), (1,)), ((), ())),
                                preferred_element_type=jnp.float32)  # (tq, S)
        s = s + mask
        m = jnp.max(s, axis=-1, keepdims=True)
        e = jnp.exp(s - m)
        p = e / jnp.sum(e, axis=-1, keepdims=True)               # exact softmax
        ctx_parts.append(
            jnp.dot(p.astype(jnp.bfloat16), v_sc[h],
                    preferred_element_type=jnp.float32).astype(jnp.bfloat16))
    # Head-major concat == PyTorch's `.transpose(1,2).view(..., d_model)` order,
    # then one full-K output projection.
    ctx = jnp.concatenate(ctx_parts, axis=-1)                    # (tq, D) bf16
    attn_out = jnp.dot(ctx, wo_ref[...],
                       preferred_element_type=jnp.float32)       # (tq, D) f32

    y1 = _layer_norm(x + attn_out, g1_ref[...], be1_ref[...])

    # ---- position-wise feed forward -----------------------------------------
    h1 = jnp.dot(y1.astype(jnp.bfloat16), w1_ref[...],
                 preferred_element_type=jnp.float32) + b1_ref[...]
    h1 = jnp.maximum(h1, 0.0)
    h2 = jnp.dot(h1.astype(jnp.bfloat16), w2_ref[...],
                 preferred_element_type=jnp.float32) + b2_ref[...]
    y2 = _layer_norm(y1 + h2, g2_ref[...], be2_ref[...])

    out_ref[0] = y2.astype(out_ref.dtype)


def prepare_params(params, *, n_heads):
    """f32 PyTorch-layout params -> scaled bf16 matmul weights (f32 biases/LN).

    Column/row order of wq/wk/wv/wo already matches the head-major concat
    layout used by the PyTorch module, so no reshaping is needed.
    """
    (wq, wk, wv, wo, w1, b1, w2, b2, g1, be1, g2, be2) = params
    D = wq.shape[0]
    assert D % n_heads == 0
    d_k = D // n_heads
    inv_temp = 1.0 / (d_k ** 0.5)
    return ((wq * inv_temp).astype(jnp.bfloat16),   # fold 1/sqrt(d_k) into Wq
            wk.astype(jnp.bfloat16),
            wv.astype(jnp.bfloat16),
            wo.astype(jnp.bfloat16),
            w1.astype(jnp.bfloat16), b1,
            w2.astype(jnp.bfloat16), b2,
            g1, be1, g2, be2)


def _device_kind():
    try:
        return jax.devices()[0].device_kind.lower()
    except Exception:  # pragma: no cover
        return ""


def transformer_block(x, mask, prepared, *, n_heads, q_tile=None,
                      single_buffer_weights=False):
    """x: (B, S, D) f32; mask: (S, S) f32 additive mask (broadcast over B, H)."""
    B, S, D = x.shape
    (wq, wk, wv, wo, w1, b1, w2, b2, g1, be1, g2, be2) = prepared
    d_inner = w1.shape[1]
    d_k = D // n_heads
    kind = _device_kind()

    if q_tile is None:
        # 256 fills the 256-row MXU on v6e/v7x; v5e's MXU is 128-wide.
        q_tile = 128 if ("v5 lite" in kind or "v5e" in kind) else 256
    tq = min(q_tile, S)
    if S % tq != 0:
        tq = S                      # fallback: single query tile
    nq = S // tq

    mask3 = mask.reshape(1, S, S).astype(jnp.float32)   # batch-invariant stream
    x_kv = x.astype(jnp.bfloat16)                       # bf16 K/V source stream

    def const_spec(shape):
        idx = lambda b, qi, _nd=len(shape): (0,) * _nd
        if single_buffer_weights:
            # v7x (64 MiB VMEM): grid-invariant operands need no double buffer.
            return pl.BlockSpec(shape, idx, pipeline_mode=pl.Buffered(1))
        return pl.BlockSpec(shape, idx)

    # Rough VMEM budget (advisory). Generation-aware cap: ~100 MiB on
    # 128-MiB-VMEM chips (v4/v5e/v6e), ~56 MiB on v7x (64 MiB physical).
    weights = (wq, wk, wv, wo, w1, b1, w2, b2, g1, be1, g2, be2)
    weight_bytes = sum(int(w.size) * np.dtype(w.dtype).itemsize for w in weights)
    blk_bytes = (
        2 * tq * D * 4                       # x query tile (dbl-buf)
        + 2 * S * D * 2                      # x_kv full seq, bf16 (dbl-buf)
        + 2 * tq * S * 4                     # mask tile (dbl-buf)
        + 2 * tq * D * 4                     # output tile (dbl-buf)
        + (1 if single_buffer_weights else 2) * weight_bytes
        + 2 * n_heads * S * d_k * 2          # K + V scratch (bf16)
        + 4 * (tq * S + tq * d_inner + 3 * tq * D) * 4   # live intermediates
        + (2 << 20))
    phys_cap = (56 << 20) if "v7" in kind else (100 << 20)
    vmem_limit = int(min(max(blk_bytes, 32 << 20), phys_cap))

    grid_spec = pltpu.PrefetchScalarGridSpec(
        num_scalar_prefetch=0,
        grid=(B, nq),
        in_specs=[
            pl.BlockSpec((1, tq, D), lambda b, qi: (b, qi, 0)),   # x (query tile)
            pl.BlockSpec((1, S, D), lambda b, qi: (b, 0, 0)),     # x (full seq, bf16)
            pl.BlockSpec((1, tq, S), lambda b, qi: (0, qi, 0)),   # mask (batch-invariant)
            const_spec((D, D)),          # wq (scaled)
            const_spec((D, D)),          # wk
            const_spec((D, D)),          # wv
            const_spec((D, D)),          # wo (fc)
            const_spec((D, d_inner)),    # w1
            const_spec((1, d_inner)),    # b1
            const_spec((d_inner, D)),    # w2
            const_spec((1, D)),          # b2
            const_spec((1, D)),          # ln1 gamma
            const_spec((1, D)),          # ln1 beta
            const_spec((1, D)),          # ln2 gamma
            const_spec((1, D)),          # ln2 beta
        ],
        out_specs=pl.BlockSpec((1, tq, D), lambda b, qi: (b, qi, 0)),
        scratch_shapes=[
            pltpu.VMEM((n_heads, S, d_k), jnp.bfloat16),   # K, head-major
            pltpu.VMEM((n_heads, S, d_k), jnp.bfloat16),   # V, head-major
        ],
    )

    return pl.pallas_call(
        functools.partial(transformer_block_kernel, n_heads=n_heads),
        out_shape=jax.ShapeDtypeStruct((B, S, D), x.dtype),
        grid_spec=grid_spec,
        compiler_params=pltpu.CompilerParams(
            # qi must stay "arbitrary": K/V scratch is filled at qi == 0.
            dimension_semantics=("parallel", "arbitrary"),
            vmem_limit_bytes=vmem_limit),
    )(x, x_kv, mask3, wq, wk, wv, wo, w1, b1, w2, b2, g1, be1, g2, be2)


# ----------------------------- references -----------------------------------

def transformer_block_ref_f32(x, mask, params, *, n_heads):
    """Pure-f32 reference matching the PyTorch forward (dropout = identity)."""
    (wq, wk, wv, wo, w1, b1, w2, b2, g1, be1, g2, be2) = params
    B, S, D = x.shape
    d_k = D // n_heads
    q = (x @ wq).reshape(B, S, n_heads, d_k).transpose(0, 2, 1, 3)
    k = (x @ wk).reshape(B, S, n_heads, d_k).transpose(0, 2, 1, 3)
    v = (x @ wv).reshape(B, S, n_heads, d_k).transpose(0, 2, 1, 3)
    attn = jnp.einsum("bhqd,bhkd->bhqk", q, k) / (d_k ** 0.5) + mask
    p = jax.nn.softmax(attn, axis=-1)
    ctx = jnp.einsum("bhqk,bhkd->bhqd", p, v).transpose(0, 2, 1, 3).reshape(B, S, D)
    y1 = _layer_norm(x + ctx @ wo, g1, be1)
    h = jnp.maximum(y1 @ w1 + b1, 0.0)
    return _layer_norm(y1 + h @ w2 + b2, g2, be2)


def transformer_block_ref_mixed(x, mask, prepared, *, n_heads):
    """Pure-JAX reference mirroring the kernel's bf16/f32 mixed precision."""
    (wq, wk, wv, wo, w1, b1, w2, b2, g1, be1, g2, be2) = prepared
    f32, bf16 = jnp.float32, jnp.bfloat16
    B, S, D = x.shape
    d_k = D // n_heads
    xb = x.astype(bf16)
    q = jnp.einsum("bsd,de->bse", xb, wq, preferred_element_type=f32)
    k = jnp.einsum("bsd,de->bse", xb, wk, preferred_element_type=f32).astype(bf16)
    v = jnp.einsum("bsd,de->bse", xb, wv, preferred_element_type=f32).astype(bf16)
    ctx_parts = []
    for h in range(n_heads):
        sl = slice(h * d_k, (h + 1) * d_k)
        s = jnp.einsum("bqe,bke->bqk", q[..., sl].astype(bf16), k[..., sl],
                       preferred_element_type=f32)
        s = s + mask
        m = jnp.max(s, axis=-1, keepdims=True)
        e = jnp.exp(s - m)
        p = e / jnp.sum(e, axis=-1, keepdims=True)
        ctx_parts.append(jnp.einsum("bqk,bke->bqe", p.astype(bf16), v[..., sl],
                                    preferred_element_type=f32).astype(bf16))
    ctx = jnp.concatenate(ctx_parts, axis=-1)
    attn_out = jnp.einsum("bqe,ed->bqd", ctx, wo, preferred_element_type=f32)
    y1 = _layer_norm(x + attn_out, g1, be1)
    h1 = jnp.maximum(
        jnp.einsum("bqd,df->bqf", y1.astype(bf16), w1, preferred_element_type=f32) + b1,
        0.0)
    h2 = jnp.einsum("bqf,fd->bqd", h1.astype(bf16), w2, preferred_element_type=f32) + b2
    return _layer_norm(y1 + h2, g2, be2)


if __name__ == "__main__":
    B, S, D, H, D_INNER = 2, 8, 32, 4, 64

    key = jax.random.PRNGKey(0)
    ks = jax.random.split(key, 9)
    scale = 1.0 / (D ** 0.5)
    wq = jax.random.normal(ks[0], (D, D), jnp.float32) * scale
    wk = jax.random.normal(ks[1], (D, D), jnp.float32) * scale
    wv = jax.random.normal(ks[2], (D, D), jnp.float32) * scale
    wo = jax.random.normal(ks[3], (D, D), jnp.float32) * scale
    w1 = jax.random.normal(ks[4], (D, D_INNER), jnp.float32) * scale
    b1 = jax.random.normal(ks[5], (1, D_INNER), jnp.float32) * 0.01
    w2 = jax.random.normal(ks[6], (D_INNER, D), jnp.float32) * (1.0 / (D_INNER ** 0.5))
    b2 = jax.random.normal(ks[7], (1, D), jnp.float32) * 0.01
    g1 = jnp.ones((1, D), jnp.float32)
    be1 = jnp.zeros((1, D), jnp.float32)
    g2 = jnp.ones((1, D), jnp.float32)
    be2 = jnp.zeros((1, D), jnp.float32)
    params = (wq, wk, wv, wo, w1, b1, w2, b2, g1, be1, g2, be2)
    prepared = prepare_params(params, n_heads=H)

    x = jax.random.normal(ks[8], (B, S, D), jnp.float32)
    # causal additive mask (S, S), broadcast over batch & heads
    causal = jnp.tril(jnp.ones((S, S), jnp.bool_))
    mask = jnp.where(causal, 0.0, -1e9).astype(jnp.float32)

    out = transformer_block(x, mask, prepared, n_heads=H)
    out = jax.block_until_ready(out)

    # Tight check vs. a reference mirroring the kernel's bf16/f32 precision.
    ref_mixed = transformer_block_ref_mixed(x, mask, prepared, n_heads=H)
    np.testing.assert_allclose(np.asarray(out), np.asarray(ref_mixed),
                               rtol=5e-3, atol=5e-3)
    # Loose sanity check vs. the pure-f32 PyTorch-equivalent forward
    # (tolerance covers bf16-input matmuls at D=32).
    ref_f32 = transformer_block_ref_f32(x, mask, params, n_heads=H)
    np.testing.assert_allclose(np.asarray(out), np.asarray(ref_f32),
                               rtol=1e-1, atol=1e-1)

    print("KERNEL_OK")
</pallas_src>

<mosaic_0001>
module attributes {stable_mosaic.version = 11 : i64} {
  func.func @transformer_block_kernel(%arg0: i32, %arg1: i32, %arg2: memref<1x8x32xf32, #tpu.memory_space<vmem>>, %arg3: memref<1x8x32xbf16, #tpu.memory_space<vmem>>, %arg4: memref<1x8x8xf32, #tpu.memory_space<vmem>>, %arg5: memref<32x32xbf16, #tpu.memory_space<vmem>>, %arg6: memref<32x32xbf16, #tpu.memory_space<vmem>>, %arg7: memref<32x32xbf16, #tpu.memory_space<vmem>>, %arg8: memref<32x32xbf16, #tpu.memory_space<vmem>>, %arg9: memref<32x64xbf16, #tpu.memory_space<vmem>>, %arg10: memref<1x64xf32, #tpu.memory_space<vmem>>, %arg11: memref<64x32xbf16, #tpu.memory_space<vmem>>, %arg12: memref<1x32xf32, #tpu.memory_space<vmem>>, %arg13: memref<1x32xf32, #tpu.memory_space<vmem>>, %arg14: memref<1x32xf32, #tpu.memory_space<vmem>>, %arg15: memref<1x32xf32, #tpu.memory_space<vmem>>, %arg16: memref<1x32xf32, #tpu.memory_space<vmem>>, %arg17: memref<1x8x32xf32, #tpu.memory_space<vmem>>, %arg18: memref<4x8x8xbf16, #tpu.memory_space<vmem>>, %arg19: memref<4x8x8xbf16, #tpu.memory_space<vmem>>) attributes {dimension_semantics = [#tpu.dimension_semantics<parallel>, #tpu.dimension_semantics<arbitrary>], iteration_bounds = array<i64: 2, 1>, scalar_prefetch = 0 : i64, scratch_operands = 2 : i64, tpu.core_type = #tpu.core_type<tc>, window_params = [{transform_indices = @transform_0, window_bounds = array<i64: 1, 8, 32>}, {transform_indices = @transform_1, window_bounds = array<i64: 1, 8, 32>}, {transform_indices = @transform_2, window_bounds = array<i64: 1, 8, 8>}, {pipeline_mode = #tpu.pipeline_mode<synchronous>, transform_indices = @transform_3, window_bounds = array<i64: 32, 32>}, {pipeline_mode = #tpu.pipeline_mode<synchronous>, transform_indices = @transform_4, window_bounds = array<i64: 32, 32>}, {pipeline_mode = #tpu.pipeline_mode<synchronous>, transform_indices = @transform_5, window_bounds = array<i64: 32, 32>}, {pipeline_mode = #tpu.pipeline_mode<synchronous>, transform_indices = @transform_6, window_bounds = array<i64: 32, 32>}, {pipeline_mode = #tpu.pipeline_mode<synchronous>, transform_indices = @transform_7, window_bounds = array<i64: 32, 64>}, {pipeline_mode = #tpu.pipeline_mode<synchronous>, transform_indices = @transform_8, window_bounds = array<i64: 1, 64>}, {pipeline_mode = #tpu.pipeline_mode<synchronous>, transform_indices = @transform_9, window_bounds = array<i64: 64, 32>}, {pipeline_mode = #tpu.pipeline_mode<synchronous>, transform_indices = @transform_10, window_bounds = array<i64: 1, 32>}, {pipeline_mode = #tpu.pipeline_mode<synchronous>, transform_indices = @transform_11, window_bounds = array<i64: 1, 32>}, {pipeline_mode = #tpu.pipeline_mode<synchronous>, transform_indices = @transform_12, window_bounds = array<i64: 1, 32>}, {pipeline_mode = #tpu.pipeline_mode<synchronous>, transform_indices = @transform_13, window_bounds = array<i64: 1, 32>}, {pipeline_mode = #tpu.pipeline_mode<synchronous>, transform_indices = @transform_14, window_bounds = array<i64: 1, 32>}, {transform_indices = @transform_15, window_bounds = array<i64: 1, 8, 32>}]} {
    %c0_i32 = arith.constant 0 : i32
    %0 = arith.cmpi eq, %arg1, %c0_i32 : i32
    %1 = arith.extui %0 : i1 to i32
    %c0_i32_0 = arith.constant 0 : i32
    %2 = arith.cmpi ne, %1, %c0_i32_0 : i32
    scf.if %2 {
      %c0_80 = arith.constant 0 : index
      %c0_81 = arith.constant 0 : index
      %c0_82 = arith.constant 0 : index
      %160 = vector.load %arg3[%c0_80, %c0_81, %c0_82] : memref<1x8x32xbf16, #tpu.memory_space<vmem>>, vector<1x8x32xbf16>
      %161 = vector.shape_cast %160 : vector<1x8x32xbf16> to vector<8x32xbf16>
      %c0_83 = arith.constant 0 : index
      %c0_84 = arith.constant 0 : index
      %162 = vector.load %arg6[%c0_83, %c0_84] : memref<32x32xbf16, #tpu.memory_space<vmem>>, vector<32x32xbf16>
      %cst_85 = arith.constant dense<0.000000e+00> : vector<8x32xf32>
      %163 = tpu.matmul %161, %162, %cst_85 {dimension_numbers = #tpu.dot_dimension_numbers<[1], [0], [0], [1], [0, 0, 1, 1], [], []>} : vector<8x32xbf16>, vector<32x32xbf16>, vector<8x32xf32> -> vector<8x32xf32>
      %164 = arith.truncf %163 : vector<8x32xf32> to vector<8x32xbf16>
      %c0_86 = arith.constant 0 : index
      %c0_87 = arith.constant 0 : index
      %165 = vector.load %arg7[%c0_86, %c0_87] : memref<32x32xbf16, #tpu.memory_space<vmem>>, vector<32x32xbf16>
      %cst_88 = arith.constant dense<0.000000e+00> : vector<8x32xf32>
      %166 = tpu.matmul %161, %165, %cst_88 {dimension_numbers = #tpu.dot_dimension_numbers<[1], [0], [0], [1], [0, 0, 1, 1], [], []>} : vector<8x32xbf16>, vector<32x32xbf16>, vector<8x32xf32> -> vector<8x32xf32>
      %167 = arith.truncf %166 : vector<8x32xf32> to vector<8x32xbf16>
      %168 = vector.extract_strided_slice %164 {offsets = [0, 0], sizes = [8, 8], strides = [1, 1]} : vector<8x32xbf16> to vector<8x8xbf16>
      %c0_89 = arith.constant 0 : index
      %c0_90 = arith.constant 0 : index
      %c0_91 = arith.constant 0 : index
      %169 = vector.load %arg18[%c0_89, %c0_90, %c0_91] : memref<4x8x8xbf16, #tpu.memory_space<vmem>>, vector<1x8x8xbf16>
      %170 = vector.shape_cast %169 : vector<1x8x8xbf16> to vector<8x8xbf16>
      %171 = vector.shape_cast %168 : vector<8x8xbf16> to vector<1x8x8xbf16>
      tpu.vector_store %arg18[%c0_89, %c0_90, %c0_91], %171 {strides = array<i32>} : memref<4x8x8xbf16, #tpu.memory_space<vmem>>, vector<1x8x8xbf16>,
      %172 = vector.extract_strided_slice %167 {offsets = [0, 0], sizes = [8, 8], strides = [1, 1]} : vector<8x32xbf16> to vector<8x8xbf16>
      %c0_92 = arith.constant 0 : index
      %c0_93 = arith.constant 0 : index
      %c0_94 = arith.constant 0 : index
      %173 = vector.load %arg19[%c0_92, %c0_93, %c0_94] : memref<4x8x8xbf16, #tpu.memory_space<vmem>>, vector<1x8x8xbf16>
      %174 = vector.shape_cast %173 : vector<1x8x8xbf16> to vector<8x8xbf16>
      %175 = vector.shape_cast %172 : vector<8x8xbf16> to vector<1x8x8xbf16>
      tpu.vector_store %arg19[%c0_92, %c0_93, %c0_94], %175 {strides = array<i32>} : memref<4x8x8xbf16, #tpu.memory_space<vmem>>, vector<1x8x8xbf16>,
      %176 = vector.extract_strided_slice %164 {offsets = [0, 8], sizes = [8, 8], strides = [1, 1]} : vector<8x32xbf16> to vector<8x8xbf16>
      %c1_95 = arith.constant 1 : index
      %c0_96 = arith.constant 0 : index
      %c0_97 = arith.constant 0 : index
      %177 = vector.load %arg18[%c1_95, %c0_96, %c0_97] : memref<4x8x8xbf16, #tpu.memory_space<vmem>>, vector<1x8x8xbf16>
      %178 = vector.shape_cast %177 : vector<1x8x8xbf16> to vector<8x8xbf16>
      %179 = vector.shape_cast %176 : vector<8x8xbf16> to vector<1x8x8xbf16>
      tpu.vector_store %arg18[%c1_95, %c0_96, %c0_97], %179 {strides = array<i32>} : memref<4x8x8xbf16, #tpu.memory_space<vmem>>, vector<1x8x8xbf16>,
      %180 = vector.extract_strided_slice %167 {offsets = [0, 8], sizes = [8, 8], strides = [1, 1]} : vector<8x32xbf16> to vector<8x8xbf16>
      %c1_98 = arith.constant 1 : index
      %c0_99 = arith.constant 0 : index
      %c0_100 = arith.constant 0 : index
      %181 = vector.load %arg19[%c1_98, %c0_99, %c0_100] : memref<4x8x8xbf16, #tpu.memory_space<vmem>>, vector<1x8x8xbf16>
      %182 = vector.shape_cast %181 : vector<1x8x8xbf16> to vector<8x8xbf16>
      %183 = vector.shape_cast %180 : vector<8x8xbf16> to vector<1x8x8xbf16>
      tpu.vector_store %arg19[%c1_98, %c0_99, %c0_100], %183 {strides = array<i32>} : memref<4x8x8xbf16, #tpu.memory_space<vmem>>, vector<1x8x8xbf16>,
      %184 = vector.extract_strided_slice %164 {offsets = [0, 16], sizes = [8, 8], strides = [1, 1]} : vector<8x32xbf16> to vector<8x8xbf16>
      %c2_101 = arith.constant 2 : index
      %c0_102 = arith.constant 0 : index
      %c0_103 = arith.constant 0 : index
      %185 = vector.load %arg18[%c2_101, %c0_102, %c0_103] : memref<4x8x8xbf16, #tpu.memory_space<vmem>>, vector<1x8x8xbf16>
      %186 = vector.shape_cast %185 : vector<1x8x8xbf16> to vector<8x8xbf16>
      %187 = vector.shape_cast %184 : vector<8x8xbf16> to vector<1x8x8xbf16>
      tpu.vector_store %arg18[%c2_101, %c0_102, %c0_103], %187 {strides = array<i32>} : memref<4x8x8xbf16, #tpu.memory_space<vmem>>, vector<1x8x8xbf16>,
      %188 = vector.extract_strided_slice %167 {offsets = [0, 16], sizes = [8, 8], strides = [1, 1]} : vector<8x32xbf16> to vector<8x8xbf16>
      %c2_104 = arith.constant 2 : index
      %c0_105 = arith.constant 0 : index
      %c0_106 = arith.constant 0 : index
      %189 = vector.load %arg19[%c2_104, %c0_105, %c0_106] : memref<4x8x8xbf16, #tpu.memory_space<vmem>>, vector<1x8x8xbf16>
      %190 = vector.shape_cast %189 : vector<1x8x8xbf16> to vector<8x8xbf16>
      %191 = vector.shape_cast %188 : vector<8x8xbf16> to vector<1x8x8xbf16>
      tpu.vector_store %arg19[%c2_104, %c0_105, %c0_106], %191 {strides = array<i32>} : memref<4x8x8xbf16, #tpu.memory_space<vmem>>, vector<1x8x8xbf16>,
      %192 = vector.extract_strided_slice %164 {offsets = [0, 24], sizes = [8, 8], strides = [1, 1]} : vector<8x32xbf16> to vector<8x8xbf16>
      %c3_107 = arith.constant 3 : index
      %c0_108 = arith.constant 0 : index
      %c0_109 = arith.constant 0 : index
      %193 = vector.load %arg18[%c3_107, %c0_108, %c0_109] : memref<4x8x8xbf16, #tpu.memory_space<vmem>>, vector<1x8x8xbf16>
      %194 = vector.shape_cast %193 : vector<1x8x8xbf16> to vector<8x8xbf16>
      %195 = vector.shape_cast %192 : vector<8x8xbf16> to vector<1x8x8xbf16>
      tpu.vector_store %arg18[%c3_107, %c0_108, %c0_109], %195 {strides = array<i32>} : memref<4x8x8xbf16, #tpu.memory_space<vmem>>, vector<1x8x8xbf16>,
      %196 = vector.extract_strided_slice %167 {offsets = [0, 24], sizes = [8, 8], strides = [1, 1]} : vector<8x32xbf16> to vector<8x8xbf16>
      %c3_110 = arith.constant 3 : index
      %c0_111 = arith.constant 0 : index
      %c0_112 = arith.constant 0 : index
      %197 = vector.load %arg19[%c3_110, %c0_111, %c0_112] : memref<4x8x8xbf16, #tpu.memory_space<vmem>>, vector<1x8x8xbf16>
      %198 = vector.shape_cast %197 : vector<1x8x8xbf16> to vector<8x8xbf16>
      %199 = vector.shape_cast %196 : vector<8x8xbf16> to vector<1x8x8xbf16>
      tpu.vector_store %arg19[%c3_110, %c0_111, %c0_112], %199 {strides = array<i32>} : memref<4x8x8xbf16, #tpu.memory_space<vmem>>, vector<1x8x8xbf16>,
    } else {
    }
    %c0 = arith.constant 0 : index
    %c0_1 = arith.constant 0 : index
    %c0_2 = arith.constant 0 : index
    %3 = vector.load %arg2[%c0, %c0_1, %c0_2] : memref<1x8x32xf32, #tpu.memory_space<vmem>>, vector<1x8x32xf32>
    %4 = vector.shape_cast %3 : vector<1x8x32xf32> to vector<8x32xf32>
    %5 = arith.truncf %4 : vector<8x32xf32> to vector<8x32xbf16>
    %c0_3 = arith.constant 0 : index
    %c0_4 = arith.constant 0 : index
    %c0_5 = arith.constant 0 : index
    %6 = vector.load %arg4[%c0_3, %c0_4, %c0_5] : memref<1x8x8xf32, #tpu.memory_space<vmem>>, vector<1x8x8xf32>
    %7 = vector.shape_cast %6 : vector<1x8x8xf32> to vector<8x8xf32>
    %c0_6 = arith.constant 0 : index
    %c0_7 = arith.constant 0 : index
    %8 = vector.load %arg5[%c0_6, %c0_7] : memref<32x32xbf16, #tpu.memory_space<vmem>>, vector<32x32xbf16>
    %cst = arith.constant dense<0.000000e+00> : vector<8x32xf32>
    %9 = tpu.matmul %5, %8, %cst {dimension_numbers = #tpu.dot_dimension_numbers<[1], [0], [0], [1], [0, 0, 1, 1], [], []>} : vector<8x32xbf16>, vector<32x32xbf16>, vector<8x32xf32> -> vector<8x32xf32>
    %10 = vector.extract_strided_slice %9 {offsets = [0, 0], sizes = [8, 8], strides = [1, 1]} : vector<8x32xf32> to vector<8x8xf32>
    %11 = arith.truncf %10 : vector<8x8xf32> to vector<8x8xbf16>
    %c0_8 = arith.constant 0 : index
    %c0_9 = arith.constant 0 : index
    %c0_10 = arith.constant 0 : index
    %12 = vector.load %arg18[%c0_8, %c0_9, %c0_10] : memref<4x8x8xbf16, #tpu.memory_space<vmem>>, vector<1x8x8xbf16>
    %13 = vector.shape_cast %12 : vector<1x8x8xbf16> to vector<8x8xbf16>
    %cst_11 = arith.constant dense<0.000000e+00> : vector<8x8xf32>
    %14 = tpu.matmul %11, %13, %cst_11 {dimension_numbers = #tpu.dot_dimension_numbers<[1], [1], [0], [0], [0, 0, 1, 0], [], []>} : vector<8x8xbf16>, vector<8x8xbf16>, vector<8x8xf32> -> vector<8x8xf32>
    %15 = arith.addf %14, %7 : vector<8x8xf32>
    %cst_12 = arith.constant dense<0xFF800000> : vector<8xf32>
    %16 = vector.multi_reduction <maximumf>, %15, %cst_12 [1] : vector<8x8xf32> to vector<8xf32>
    %17 = vector.shape_cast %16 : vector<8xf32> to vector<8x1xf32>
    %18 = vector.broadcast %17 : vector<8x1xf32> to vector<8x8xf32>
    %19 = arith.subf %15, %18 : vector<8x8xf32>
    %20 = math.exp %19 : vector<8x8xf32>
    %cst_13 = arith.constant dense<0.000000e+00> : vector<8xf32>
    %21 = vector.multi_reduction <add>, %20, %cst_13 [1] : vector<8x8xf32> to vector<8xf32>
    %22 = vector.shape_cast %21 : vector<8xf32> to vector<8x1xf32>
    %23 = vector.broadcast %22 : vector<8x1xf32> to vector<8x8xf32>
    %24 = arith.divf %20, %23 : vector<8x8xf32>
    %25 = arith.truncf %24 : vector<8x8xf32> to vector<8x8xbf16>
    %c0_14 = arith.constant 0 : index
    %c0_15 = arith.constant 0 : index
    %c0_16 = arith.constant 0 : index
    %26 = vector.load %arg19[%c0_14, %c0_15, %c0_16] : memref<4x8x8xbf16, #tpu.memory_space<vmem>>, vector<1x8x8xbf16>
    %27 = vector.shape_cast %26 : vector<1x8x8xbf16> to vector<8x8xbf16>
    %cst_17 = arith.constant dense<0.000000e+00> : vector<8x8xf32>
    %28 = tpu.matmul %25, %27, %cst_17 {dimension_numbers = #tpu.dot_dimension_numbers<[1], [0], [0], [1], [0, 0, 1, 1], [], []>} : vector<8x8xbf16>, vector<8x8xbf16>, vector<8x8xf32> -> vector<8x8xf32>
    %29 = arith.truncf %28 : vector<8x8xf32> to vector<8x8xbf16>
    %30 = vector.extract_strided_slice %9 {offsets = [0, 8], sizes = [8, 8], strides = [1, 1]} : vector<8x32xf32> to vector<8x8xf32>
    %31 = arith.truncf %30 : vector<8x8xf32> to vector<8x8xbf16>
    %c1 = arith.constant 1 : index
    %c0_18 = arith.constant 0 : index
    %c0_19 = arith.constant 0 : index
    %32 = vector.load %arg18[%c1, %c0_18, %c0_19] : memref<4x8x8xbf16, #tpu.memory_space<vmem>>, vector<1x8x8xbf16>
    %33 = vector.shape_cast %32 : vector<1x8x8xbf16> to vector<8x8xbf16>
    %cst_20 = arith.constant dense<0.000000e+00> : vector<8x8xf32>
    %34 = tpu.matmul %31, %33, %cst_20 {dimension_numbers = #tpu.dot_dimension_numbers<[1], [1], [0], [0], [0, 0, 1, 0], [], []>} : vector<8x8xbf16>, vector<8x8xbf16>, vector<8x8xf32> -> vector<8x8xf32>
    %35 = arith.addf %34, %7 : vector<8x8xf32>
    %cst_21 = arith.constant dense<0xFF800000> : vector<8xf32>
    %36 = vector.multi_reduction <maximumf>, %35, %cst_21 [1] : vector<8x8xf32> to vector<8xf32>
    %37 = vector.shape_cast %36 : vector<8xf32> to vector<8x1xf32>
    %38 = vector.broadcast %37 : vector<8x1xf32> to vector<8x8xf32>
    %39 = arith.subf %35, %38 : vector<8x8xf32>
    %40 = math.exp %39 : vector<8x8xf32>
    %cst_22 = arith.constant dense<0.000000e+00> : vector<8xf32>
    %41 = vector.multi_reduction <add>, %40, %cst_22 [1] : vector<8x8xf32> to vector<8xf32>
    %42 = vector.shape_cast %41 : vector<8xf32> to vector<8x1xf32>
    %43 = vector.broadcast %42 : vector<8x1xf32> to vector<8x8xf32>
    %44 = arith.divf %40, %43 : vector<8x8xf32>
    %45 = arith.truncf %44 : vector<8x8xf32> to vector<8x8xbf16>
    %c1_23 = arith.constant 1 : index
    %c0_24 = arith.constant 0 : index
    %c0_25 = arith.constant 0 : index
    %46 = vector.load %arg19[%c1_23, %c0_24, %c0_25] : memref<4x8x8xbf16, #tpu.memory_space<vmem>>, vector<1x8x8xbf16>
    %47 = vector.shape_cast %46 : vector<1x8x8xbf16> to vector<8x8xbf16>
    %cst_26 = arith.constant dense<0.000000e+00> : vector<8x8xf32>
    %48 = tpu.matmul %45, %47, %cst_26 {dimension_numbers = #tpu.dot_dimension_numbers<[1], [0], [0], [1], [0, 0, 1, 1], [], []>} : vector<8x8xbf16>, vector<8x8xbf16>, vector<8x8xf32> -> vector<8x8xf32>
    %49 = arith.truncf %48 : vector<8x8xf32> to vector<8x8xbf16>
    %50 = vector.extract_strided_slice %9 {offsets = [0, 16], sizes = [8, 8], strides = [1, 1]} : vector<8x32xf32> to vector<8x8xf32>
    %51 = arith.truncf %50 : vector<8x8xf32> to vector<8x8xbf16>
    %c2 = arith.constant 2 : index
    %c0_27 = arith.constant 0 : index
    %c0_28 = arith.constant 0 : index
    %52 = vector.load %arg18[%c2, %c0_27, %c0_28] : memref<4x8x8xbf16, #tpu.memory_space<vmem>>, vector<1x8x8xbf16>
    %53 = vector.shape_cast %52 : vector<1x8x8xbf16> to vector<8x8xbf16>
    %cst_29 = arith.constant dense<0.000000e+00> : vector<8x8xf32>
    %54 = tpu.matmul %51, %53, %cst_29 {dimension_numbers = #tpu.dot_dimension_numbers<[1], [1], [0], [0], [0, 0, 1, 0], [], []>} : vector<8x8xbf16>, vector<8x8xbf16>, vector<8x8xf32> -> vector<8x8xf32>
    %55 = arith.addf %54, %7 : vector<8x8xf32>
    %cst_30 = arith.constant dense<0xFF800000> : vector<8xf32>
    %56 = vector.multi_reduction <maximumf>, %55, %cst_30 [1] : vector<8x8xf32> to vector<8xf32>
    %57 = vector.shape_cast %56 : vector<8xf32> to vector<8x1xf32>
    %58 = vector.broadcast %57 : vector<8x1xf32> to vector<8x8xf32>
    %59 = arith.subf %55, %58 : vector<8x8xf32>
    %60 = math.exp %59 : vector<8x8xf32>
    %cst_31 = arith.constant dense<0.000000e+00> : vector<8xf32>
    %61 = vector.multi_reduction <add>, %60, %cst_31 [1] : vector<8x8xf32> to vector<8xf32>
    %62 = vector.shape_cast %61 : vector<8xf32> to vector<8x1xf32>
    %63 = vector.broadcast %62 : vector<8x1xf32> to vector<8x8xf32>
    %64 = arith.divf %60, %63 : vector<8x8xf32>
    %65 = arith.truncf %64 : vector<8x8xf32> to vector<8x8xbf16>
    %c2_32 = arith.constant 2 : index
    %c0_33 = arith.constant 0 : index
    %c0_34 = arith.constant 0 : index
    %66 = vector.load %arg19[%c2_32, %c0_33, %c0_34] : memref<4x8x8xbf16, #tpu.memory_space<vmem>>, vector<1x8x8xbf16>
    %67 = vector.shape_cast %66 : vector<1x8x8xbf16> to vector<8x8xbf16>
    %cst_35 = arith.constant dense<0.000000e+00> : vector<8x8xf32>
    %68 = tpu.matmul %65, %67, %cst_35 {dimension_numbers = #tpu.dot_dimension_numbers<[1], [0], [0], [1], [0, 0, 1, 1], [], []>} : vector<8x8xbf16>, vector<8x8xbf16>, vector<8x8xf32> -> vector<8x8xf32>
    %69 = arith.truncf %68 : vector<8x8xf32> to vector<8x8xbf16>
    %70 = vector.extract_strided_slice %9 {offsets = [0, 24], sizes = [8, 8], strides = [1, 1]} : vector<8x32xf32> to vector<8x8xf32>
    %71 = arith.truncf %70 : vector<8x8xf32> to vector<8x8xbf16>
    %c3 = arith.constant 3 : index
    %c0_36 = arith.constant 0 : index
    %c0_37 = arith.constant 0 : index
    %72 = vector.load %arg18[%c3, %c0_36, %c0_37] : memref<4x8x8xbf16, #tpu.memory_space<vmem>>, vector<1x8x8xbf16>
    %73 = vector.shape_cast %72 : vector<1x8x8xbf16> to vector<8x8xbf16>
    %cst_38 = arith.constant dense<0.000000e+00> : vector<8x8xf32>
    %74 = tpu.matmul %71, %73, %cst_38 {dimension_numbers = #tpu.dot_dimension_numbers<[1], [1], [0], [0], [0, 0, 1, 0], [], []>} : vector<8x8xbf16>, vector<8x8xbf16>, vector<8x8xf32> -> vector<8x8xf32>
    %75 = arith.addf %74, %7 : vector<8x8xf32>
    %cst_39 = arith.constant dense<0xFF800000> : vector<8xf32>
    %76 = vector.multi_reduction <maximumf>, %75, %cst_39 [1] : vector<8x8xf32> to vector<8xf32>
    %77 = vector.shape_cast %76 : vector<8xf32> to vector<8x1xf32>
    %78 = vector.broadcast %77 : vector<8x1xf32> to vector<8x8xf32>
    %79 = arith.subf %75, %78 : vector<8x8xf32>
    %80 = math.exp %79 : vector<8x8xf32>
    %cst_40 = arith.constant dense<0.000000e+00> : vector<8xf32>
    %81 = vector.multi_reduction <add>, %80, %cst_40 [1] : vector<8x8xf32> to vector<8xf32>
    %82 = vector.shape_cast %81 : vector<8xf32> to vector<8x1xf32>
    %83 = vector.broadcast %82 : vector<8x1xf32> to vector<8x8xf32>
    %84 = arith.divf %80, %83 : vector<8x8xf32>
    %85 = arith.truncf %84 : vector<8x8xf32> to vector<8x8xbf16>
    %c3_41 = arith.constant 3 : index
    %c0_42 = arith.constant 0 : index
    %c0_43 = arith.constant 0 : index
    %86 = vector.load %arg19[%c3_41, %c0_42, %c0_43] : memref<4x8x8xbf16, #tpu.memory_space<vmem>>, vector<1x8x8xbf16>
    %87 = vector.shape_cast %86 : vector<1x8x8xbf16> to vector<8x8xbf16>
    %cst_44 = arith.constant dense<0.000000e+00> : vector<8x8xf32>
    %88 = tpu.matmul %85, %87, %cst_44 {dimension_numbers = #tpu.dot_dimension_numbers<[1], [0], [0], [1], [0, 0, 1, 1], [], []>} : vector<8x8xbf16>, vector<8x8xbf16>, vector<8x8xf32> -> vector<8x8xf32>
    %89 = arith.truncf %88 : vector<8x8xf32> to vector<8x8xbf16>
    %90 = tpu.concatenate %29, %49, %69, %89 in 1 : vector<8x8xbf16>, vector<8x8xbf16>, vector<8x8xbf16>, vector<8x8xbf16> -> vector<8x32xbf16>
    %c0_45 = arith.constant 0 : index
    %c0_46 = arith.constant 0 : index
    %91 = vector.load %arg8[%c0_45, %c0_46] : memref<32x32xbf16, #tpu.memory_space<vmem>>, vector<32x32xbf16>
    %cst_47 = arith.constant dense<0.000000e+00> : vector<8x32xf32>
    %92 = tpu.matmul %90, %91, %cst_47 {dimension_numbers = #tpu.dot_dimension_numbers<[1], [0], [0], [1], [0, 0, 1, 1], [], []>} : vector<8x32xbf16>, vector<32x32xbf16>, vector<8x32xf32> -> vector<8x32xf32>
    %93 = arith.addf %4, %92 : vector<8x32xf32>
    %c0_48 = arith.constant 0 : index
    %c0_49 = arith.constant 0 : index
    %94 = vector.load %arg13[%c0_48, %c0_49] : memref<1x32xf32, #tpu.memory_space<vmem>>, vector<1x32xf32>
    %c0_50 = arith.constant 0 : index
    %c0_51 = arith.constant 0 : index
    %95 = vector.load %arg14[%c0_50, %c0_51] : memref<1x32xf32, #tpu.memory_space<vmem>>, vector<1x32xf32>
    %cst_52 = arith.constant dense<0.000000e+00> : vector<8xf32>
    %96 = vector.multi_reduction <add>, %93, %cst_52 [1] : vector<8x32xf32> to vector<8xf32>
    %97 = vector.shape_cast %96 : vector<8xf32> to vector<8x1xf32>
    %cst_53 = arith.constant 3.200000e+01 : f32
    %98 = vector.broadcast %cst_53 : f32 to vector<8x1xf32>
    %99 = arith.divf %97, %98 : vector<8x1xf32>
    %100 = vector.broadcast %99 : vector<8x1xf32> to vector<8x32xf32>
    %101 = arith.subf %93, %100 : vector<8x32xf32>
    %102 = arith.mulf %101, %101 : vector<8x32xf32>
    %cst_54 = arith.constant dense<0.000000e+00> : vector<8xf32>
    %103 = vector.multi_reduction <add>, %102, %cst_54 [1] : vector<8x32xf32> to vector<8xf32>
    %104 = vector.shape_cast %103 : vector<8xf32> to vector<8x1xf32>
    %cst_55 = arith.constant 3.200000e+01 : f32
    %105 = vector.broadcast %cst_55 : f32 to vector<8x1xf32>
    %106 = arith.divf %104, %105 : vector<8x1xf32>
    %107 = vector.broadcast %99 : vector<8x1xf32> to vector<8x32xf32>
    %108 = arith.subf %93, %107 : vector<8x32xf32>
    %cst_56 = arith.constant 9.99999997E-7 : f32
    %109 = vector.broadcast %cst_56 : f32 to vector<8x1xf32>
    %110 = arith.addf %106, %109 : vector<8x1xf32>
    %111 = math.rsqrt %110 : vector<8x1xf32>
    %112 = vector.broadcast %111 : vector<8x1xf32> to vector<8x32xf32>
    %113 = arith.mulf %108, %112 : vector<8x32xf32>
    %114 = vector.broadcast %94 : vector<1x32xf32> to vector<8x32xf32>
    %115 = arith.mulf %113, %114 : vector<8x32xf32>
    %116 = vector.broadcast %95 : vector<1x32xf32> to vector<8x32xf32>
    %117 = arith.addf %115, %116 : vector<8x32xf32>
    %118 = arith.truncf %117 : vector<8x32xf32> to vector<8x32xbf16>
    %c0_57 = arith.constant 0 : index
    %c0_58 = arith.constant 0 : index
    %119 = vector.load %arg9[%c0_57, %c0_58] : memref<32x64xbf16, #tpu.memory_space<vmem>>, vector<32x64xbf16>
    %cst_59 = arith.constant dense<0.000000e+00> : vector<8x64xf32>
    %120 = tpu.matmul %118, %119, %cst_59 {dimension_numbers = #tpu.dot_dimension_numbers<[1], [0], [0], [1], [0, 0, 1, 1], [], []>} : vector<8x32xbf16>, vector<32x64xbf16>, vector<8x64xf32> -> vector<8x64xf32>
    %c0_60 = arith.constant 0 : index
    %c0_61 = arith.constant 0 : index
    %121 = vector.load %arg10[%c0_60, %c0_61] : memref<1x64xf32, #tpu.memory_space<vmem>>, vector<1x64xf32>
    %122 = vector.broadcast %121 : vector<1x64xf32> to vector<8x64xf32>
    %123 = arith.addf %120, %122 : vector<8x64xf32>
    %cst_62 = arith.constant 0.000000e+00 : f32
    %124 = vector.broadcast %cst_62 : f32 to vector<8x64xf32>
    %125 = arith.maximumf %123, %124 : vector<8x64xf32>
    %126 = arith.truncf %125 : vector<8x64xf32> to vector<8x64xbf16>
    %c0_63 = arith.constant 0 : index
    %c0_64 = arith.constant 0 : index
    %127 = vector.load %arg11[%c0_63, %c0_64] : memref<64x32xbf16, #tpu.memory_space<vmem>>, vector<64x32xbf16>
    %cst_65 = arith.constant dense<0.000000e+00> : vector<8x32xf32>
    %128 = tpu.matmul %126, %127, %cst_65 {dimension_numbers = #tpu.dot_dimension_numbers<[1], [0], [0], [1], [0, 0, 1, 1], [], []>} : vector<8x64xbf16>, vector<64x32xbf16>, vector<8x32xf32> -> vector<8x32xf32>
    %c0_66 = arith.constant 0 : index
    %c0_67 = arith.constant 0 : index
    %129 = vector.load %arg12[%c0_66, %c0_67] : memref<1x32xf32, #tpu.memory_space<vmem>>, vector<1x32xf32>
    %130 = vector.broadcast %129 : vector<1x32xf32> to vector<8x32xf32>
    %131 = arith.addf %128, %130 : vector<8x32xf32>
    %132 = arith.addf %117, %131 : vector<8x32xf32>
    %c0_68 = arith.constant 0 : index
    %c0_69 = arith.constant 0 : index
    %133 = vector.load %arg15[%c0_68, %c0_69] : memref<1x32xf32, #tpu.memory_space<vmem>>, vector<1x32xf32>
    %c0_70 = arith.constant 0 : index
    %c0_71 = arith.constant 0 : index
    %134 = vector.load %arg16[%c0_70, %c0_71] : memref<1x32xf32, #tpu.memory_space<vmem>>, vector<1x32xf32>
    %cst_72 = arith.constant dense<0.000000e+00> : vector<8xf32>
    %135 = vector.multi_reduction <add>, %132, %cst_72 [1] : vector<8x32xf32> to vector<8xf32>
    %136 = vector.shape_cast %135 : vector<8xf32> to vector<8x1xf32>
    %cst_73 = arith.constant 3.200000e+01 : f32
    %137 = vector.broadcast %cst_73 : f32 to vector<8x1xf32>
    %138 = arith.divf %136, %137 : vector<8x1xf32>
    %139 = vector.broadcast %138 : vector<8x1xf32> to vector<8x32xf32>
    %140 = arith.subf %132, %139 : vector<8x32xf32>
    %141 = arith.mulf %140, %140 : vector<8x32xf32>
    %cst_74 = arith.constant dense<0.000000e+00> : vector<8xf32>
    %142 = vector.multi_reduction <add>, %141, %cst_74 [1] : vector<8x32xf32> to vector<8xf32>
    %143 = vector.shape_cast %142 : vector<8xf32> to vector<8x1xf32>
    %cst_75 = arith.constant 3.200000e+01 : f32
    %144 = vector.broadcast %cst_75 : f32 to vector<8x1xf32>
    %145 = arith.divf %143, %144 : vector<8x1xf32>
    %146 = vector.broadcast %138 : vector<8x1xf32> to vector<8x32xf32>
    %147 = arith.subf %132, %146 : vector<8x32xf32>
    %cst_76 = arith.constant 9.99999997E-7 : f32
    %148 = vector.broadcast %cst_76 : f32 to vector<8x1xf32>
    %149 = arith.addf %145, %148 : vector<8x1xf32>
    %150 = math.rsqrt %149 : vector<8x1xf32>
    %151 = vector.broadcast %150 : vector<8x1xf32> to vector<8x32xf32>
    %152 = arith.mulf %147, %151 : vector<8x32xf32>
    %153 = vector.broadcast %133 : vector<1x32xf32> to vector<8x32xf32>
    %154 = arith.mulf %152, %153 : vector<8x32xf32>
    %155 = vector.broadcast %134 : vector<1x32xf32> to vector<8x32xf32>
    %156 = arith.addf %154, %155 : vector<8x32xf32>
    %c0_77 = arith.constant 0 : index
    %c0_78 = arith.constant 0 : index
    %c0_79 = arith.constant 0 : index
    %157 = vector.load %arg17[%c0_77, %c0_78, %c0_79] : memref<1x8x32xf32, #tpu.memory_space<vmem>>, vector<1x8x32xf32>
    %158 = vector.shape_cast %157 : vector<1x8x32xf32> to vector<8x32xf32>
    %159 = vector.shape_cast %156 : vector<8x32xf32> to vector<1x8x32xf32>
    tpu.vector_store %arg17[%c0_77, %c0_78, %c0_79], %159 {strides = array<i32>} : memref<1x8x32xf32, #tpu.memory_space<vmem>>, vector<1x8x32xf32>,
    return
  }
  func.func @transform_0(%arg0: i32, %arg1: i32) -> (i32, i32, i32) {
    %c0_i32 = arith.constant 0 : i32
    %c0_i32_0 = arith.constant 0 : i32
    return %arg0, %arg1, %c0_i32 : i32, i32, i32
  }
  func.func @transform_1(%arg0: i32, %arg1: i32) -> (i32, i32, i32) {
    %c0_i32 = arith.constant 0 : i32
    %c0_i32_0 = arith.constant 0 : i32
    %c0_i32_1 = arith.constant 0 : i32
    return %arg0, %c0_i32, %c0_i32_0 : i32, i32, i32
  }
  func.func @transform_2(%arg0: i32, %arg1: i32) -> (i32, i32, i32) {
    %c0_i32 = arith.constant 0 : i32
    %c0_i32_0 = arith.constant 0 : i32
    %c0_i32_1 = arith.constant 0 : i32
    return %c0_i32, %arg1, %c0_i32_0 : i32, i32, i32
  }
  func.func @transform_3(%arg0: i32, %arg1: i32) -> (i32, i32) {
    %c0_i32 = arith.constant 0 : i32
    %c0_i32_0 = arith.constant 0 : i32
    %c0_i32_1 = arith.constant 0 : i32
    return %c0_i32, %c0_i32_0 : i32, i32
  }
  func.func @transform_4(%arg0: i32, %arg1: i32) -> (i32, i32) {
    %c0_i32 = arith.constant 0 : i32
    %c0_i32_0 = arith.constant 0 : i32
    %c0_i32_1 = arith.constant 0 : i32
    return %c0_i32, %c0_i32_0 : i32, i32
  }
  func.func @transform_5(%arg0: i32, %arg1: i32) -> (i32, i32) {
    %c0_i32 = arith.constant 0 : i32
    %c0_i32_0 = arith.constant 0 : i32
    %c0_i32_1 = arith.constant 0 : i32
    return %c0_i32, %c0_i32_0 : i32, i32
  }
  func.func @transform_6(%arg0: i32, %arg1: i32) -> (i32, i32) {
    %c0_i32 = arith.constant 0 : i32
    %c0_i32_0 = arith.constant 0 : i32
    %c0_i32_1 = arith.constant 0 : i32
    return %c0_i32, %c0_i32_0 : i32, i32
  }
  func.func @transform_7(%arg0: i32, %arg1: i32) -> (i32, i32) {
    %c0_i32 = arith.constant 0 : i32
    %c0_i32_0 = arith.constant 0 : i32
    %c0_i32_1 = arith.constant 0 : i32
    return %c0_i32, %c0_i32_0 : i32, i32
  }
  func.func @transform_8(%arg0: i32, %arg1: i32) -> (i32, i32) {
    %c0_i32 = arith.constant 0 : i32
    %c0_i32_0 = arith.constant 0 : i32
    %c0_i32_1 = arith.constant 0 : i32
    return %c0_i32, %c0_i32_0 : i32, i32
  }
  func.func @transform_9(%arg0: i32, %arg1: i32) -> (i32, i32) {
    %c0_i32 = arith.constant 0 : i32
    %c0_i32_0 = arith.constant 0 : i32
    %c0_i32_1 = arith.constant 0 : i32
    return %c0_i32, %c0_i32_0 : i32, i32
  }
  func.func @transform_10(%arg0: i32, %arg1: i32) -> (i32, i32) {
    %c0_i32 = arith.constant 0 : i32
    %c0_i32_0 = arith.constant 0 : i32
    %c0_i32_1 = arith.constant 0 : i32
    return %c0_i32, %c0_i32_0 : i32, i32
  }
  func.func @transform_11(%arg0: i32, %arg1: i32) -> (i32, i32) {
    %c0_i32 = arith.constant 0 : i32
    %c0_i32_0 = arith.constant 0 : i32
    %c0_i32_1 = arith.constant 0 : i32
    return %c0_i32, %c0_i32_0 : i32, i32
  }
  func.func @transform_12(%arg0: i32, %arg1: i32) -> (i32, i32) {
    %c0_i32 = arith.constant 0 : i32
    %c0_i32_0 = arith.constant 0 : i32
    %c0_i32_1 = arith.constant 0 : i32
    return %c0_i32, %c0_i32_0 : i32, i32
  }
  func.func @transform_13(%arg0: i32, %arg1: i32) -> (i32, i32) {
    %c0_i32 = arith.constant 0 : i32
    %c0_i32_0 = arith.constant 0 : i32
    %c0_i32_1 = arith.constant 0 : i32
    return %c0_i32, %c0_i32_0 : i32, i32
  }
  func.func @transform_14(%arg0: i32, %arg1: i32) -> (i32, i32) {
    %c0_i32 = arith.constant 0 : i32
    %c0_i32_0 = arith.constant 0 : i32
    %c0_i32_1 = arith.constant 0 : i32
    return %c0_i32, %c0_i32_0 : i32, i32
  }
  func.func @transform_15(%arg0: i32, %arg1: i32) -> (i32, i32, i32) {
    %c0_i32 = arith.constant 0 : i32
    %c0_i32_0 = arith.constant 0 : i32
    return %arg0, %arg1, %c0_i32 : i32, i32, i32
  }
}

</mosaic_0001>

<bundles_post_ra>
// kernel: tpu_custom_call.1
= control target key start
LH: loop header
LB: loop body
LE: loop exit
PB: predicated region body
PF: predicated region fallthrough
CT: control target
= control target key end

     0   :  { %s2825_s0 = inlined_call_operand.vmem [shape: f32[2,8,32], index: 0, kind: input, shape index: {}]   ;;  %s2826_s1 = inlined_call_operand.hbm [shape: bf16[2,8,32], index: 1, kind: input, shape index: {}]   ;;  %s2827_s2 = inlined_call_operand.hbm [shape: f32[1,8,8], index: 2, kind: input, shape index: {}]   ;;  %s2828_s3 = inlined_call_operand.vmem [shape: bf16[32,32], index: 3, kind: input, shape index: {}]   ;;  %s2829_s4 = inlined_call_operand.vmem [shape: bf16[32,32], index: 4, kind: input, shape index: {}]   ;;  %s2830_s5 = inlined_call_operand.hbm [shape: bf16[32,32], index: 5, kind: input, shape index: {}]   ;;  %s2831_s6 = inlined_call_operand.hbm [shape: bf16[32,32], index: 6, kind: input, shape index: {}]   ;;  %s2832_s7 = inlined_call_operand.hbm [shape: bf16[32,64], index: 7, kind: input, shape index: {}]   ;;  %s2833_s8 = inlined_call_operand.hbm [shape: f32[1,64], index: 8, kind: input, shape index: {}]   ;;  %s2834_s9 = inlined_call_operand.vmem [shape: bf16[64,32], index: 9, kind: input, shape index: {}]   ;;  %s2835_s10 = inlined_call_operand.vmem [shape: f32[1,32], index: 10, kind: input, shape index: {}]   ;;  %s2836_s11 = inlined_call_operand.vmem [shape: f32[1,32], index: 11, kind: input, shape index: {}]   ;;  %s2837_s12 = inlined_call_operand.vmem [shape: f32[1,32], index: 12, kind: input, shape index: {}]   ;;  %s2838_s13 = inlined_call_operand.vmem [shape: f32[1,32], index: 13, kind: input, shape index: {}]   ;;  %s2839_s14 = inlined_call_operand.vmem [shape: f32[1,32], index: 14, kind: input, shape index: {}]   ;;  %s2840_s15 = inlined_call_operand.hbm [shape: f32[2,8,32], index: 15, kind: output, shape index: {}]  }
   0x1   :  { %2848 = sst [smem:[#allocation24_spill]] %s2827_s2 }
   0x2   :  { %2849 = sst [smem:[#allocation25_spill]] %s2830_s5 }
   0x3   :  { %2850 = sst [smem:[#allocation26_spill]] %s2831_s6 }
   0x4   :  { %2851 = sst [smem:[#allocation27_spill]] %s2832_s7 }
   0x5   :  { %2852 = sst [smem:[#allocation28_spill]] %s2833_s8 }
   0x6   :  { %2853 = sst [smem:[#allocation29_spill]] %s2835_s10 }
   0x7   :  { %2854 = sst [smem:[#allocation30_spill]] %s2838_s13 }
   0x8   :  { %2855 = sst [smem:[#allocation31_spill]] %s2839_s14 }
   0x9   :  { %2856 = sst [smem:[#allocation32_spill]] %s2840_s15 }
   0xa   :  { %20 = vsyncpa [#allocation5], 0 }
   0xb   :  { %22 = vsyncpa [#allocation5 + $0x1], 0 }
   0xc   :  { %23 = vsyncpa [#allocation8], 0 }
   0xd   :  { %24 = vsyncpa [#allocation11], 0 }
   0xe   :  { %25 = vsyncpa [#allocation14], 0 }
   0xf   :  { %26 = vsyncpa [#allocation6], 0 }
  0x10   :  { %28 = vsyncpa [#allocation6 + $0x1], 0  ;;  %s2451_s18 = smov 0   ;;  %s2453_s19 = smov 0  }
  0x11   :  { %s2455_s20 = smov 0   ;;  %s2457_s21 = smov 0  }
  0x12   :  { %s2459_s22 = smov 0   ;;  %s2461_s23 = smov 0  }
  0x13 LB: > { %2857 = sst [smem:[#allocation21_spill]] %s2348_s22  ;;  %s2841_s24 = sadd.s32 4294967295, %s2352_s23   ;;  %s2352_s23 = sphi %s2461_s23, %s34_s23   ;;  %s2348_s22 = sphi %s2459_s22, %s2885_s22   ;;  %s2344_s21 = sphi %s2457_s21, %s2884_s21   ;;  %s2340_s20 = sphi %s2455_s20, %s2888_s20   ;;  %s2336_s19 = sphi %s2453_s19, %s2887_s19   ;;  %s2332_s18 = sphi %s2451_s18, %s2886_s18  }
  0x14   : > { %p1749_p0 = scmp.ge.s32.totalorder %s2352_s23, 1  ;;  %p2485_p1 = scmp.eq.s32.totalorder %s2841_s24, 0 }
  0x15   : > { %p411_p2 = scmp.lt.s32.totalorder %s2352_s23, 3  ;;  %s2354_s27 = smov [#allocation7]  }
  0x16   : > { %s2858_s25 = scalar_select %p2485_p1, 1, 0 }
  0x17   : > { %p2490_p3 = pnand %p1749_p0, %p411_p2  ;;  %s426_s28 = sshll.u32 %s2354_s27, 4  ;;  %s427_s28 = int_to_ptr.vmem [resolvable:$true] %s426_s28 }
  0x18   : > { %s2355_s30 = smov [#allocation10]   ;;  %s2356_s17 = smov [#allocation9]  }
  0x19   : > { %s2859_s26 = scalar_select %p2490_p3, 1, 0 }
  0x1a   : > { %p1969_p5 = pneg %p2490_p3  ;;  %s455_s16 = sshll.u32 %s2355_s30, 4  ;;  %s456_s16 = int_to_ptr.vmem [resolvable:$true] %s455_s16 }
  0x1b   : > { %s442_s24 = sshll.u32 %s2356_s17, 4  ;;  %s2113_s27 = scalar_lea.vmem %s427_s28, 128  ;;  %s443_s24 = int_to_ptr.vmem [resolvable:$true] %s442_s24 }
  0x1c   : > { %p2499_p6 = pnand %p1969_p5, %p2485_p1  ;;  %p2114_p8 = scmp.ne.s32.totalorder %s427_s28, %s2113_s27 }
  0x1d   : > { %p2121_p11 = scmp.lt.s32.totalorder %s427_s28, %s427_s28  ;;  %p2122_p12 = scmp.lt.s32.totalorder %s2113_s27, %s2113_s27 }
  0x1e   : > { %p2505_p7 = pneg %p2499_p6 }
  0x1f   : > { %p2123_p13 = por %p2122_p12, %p2121_p11 }
  0x20   : > { %p2116_p9 = pnand %p2114_p8, %p2505_p7 }
  0x22   : > { %p2117_p10 = pneg %p2116_p9 }
  0x24   : > { %p2124_p0 = pnand %p2123_p13, %p2117_p10 }
  0x26   : > { %2127 = shalt.err (!%p2124_p0)
}
  0x27   : > { %s2862_s2 = sld [smem:[#allocation24_spill]]  ;;  %s2139_s14 = scalar_lea.vmem %s456_s16, 256 }
  0x28   : > { %p2140_p2 = scmp.ne.s32.totalorder %s456_s16, %s2139_s14  ;;  %p2147_p3 = scmp.lt.s32.totalorder %s456_s16, %s456_s16 }
  0x29   : > { %p2148_p8 = scmp.lt.s32.totalorder %s2139_s14, %s2139_s14 }
  0x2a   : > { %p2142_p5 = pnand %p2140_p2, %p2505_p7 }
  0x2b   : > { %p2149_p9 = por %p2148_p8, %p2147_p3 }
  0x2c   : > { %p2143_p4 = pneg %p2142_p5 }
  0x2d   : > { %1972 = dma.hbm_to_vmem [thread:$0]  (!%p2499_p6), %s2862_s2, 128, %s427_s28, [#allocation8]  }
  0x2e   : > { %p2150_p1 = pnand %p2149_p9, %p2143_p4 }
  0x30   : > { %2153 = shalt.err (!%p2150_p1)
}
  0x31   : > { %s2357_s27 = smov 64   ;;  %s2358_s13 = smov 4  }
  0x32   : > { %s2863_s6 = sld [smem:[#allocation26_spill]]  ;;  %s2165_s17 = scalar_lea.vmem %s443_s24, 256 }
  0x33   : > { %p2166_p10 = scmp.ne.s32.totalorder %s443_s24, %s2165_s17  ;;  %p2173_p4 = scmp.lt.s32.totalorder %s443_s24, %s443_s24 }
  0x34   : > { %p2174_p1 = scmp.lt.s32.totalorder %s2165_s17, %s2165_s17 }
  0x35   : > { %p2168_p11 = pnand %p2166_p10, %p2505_p7 }
  0x36   : > { %p2175_p12 = por %p2174_p1, %p2173_p4 }
  0x37   : > { %p2169_p3 = pneg %p2168_p11 }
  0x38   : > { %1978 = dma.hbm_to_vmem [thread:$0]  (!%p2499_p6), %s2863_s6, 256, %s456_s16, [#allocation11], %s2357_s27, %s2357_s27, %s2358_s13  }
  0x39   : > { %p2176_p13 = pnand %p2175_p12, %p2169_p3 }
  0x3b   : > { %2179 = shalt.err (!%p2176_p13)
}
  0x3c   : > { %s2864_s5 = sld [smem:[#allocation25_spill]]  ;;  %s2359_s16 = smov [#allocation12]  }
  0x3d   : > { %s468_s30 = sshll.u32 %s2359_s16, 4  ;;  %s2360_s28 = smov [#allocation13]   ;;  %s469_s30 = int_to_ptr.vmem [resolvable:$true] %s468_s30 }
  0x3e   : > { %s482_s6 = sshll.u32 %s2360_s28, 4  ;;  %s2191_s10 = scalar_lea.vmem %s469_s30, 256  ;;  %s483_s6 = int_to_ptr.vmem [resolvable:$true] %s482_s6 }
  0x3f   : > { %p2192_p0 = scmp.ne.s32.totalorder %s469_s30, %s2191_s10  ;;  %p2199_p8 = scmp.lt.s32.totalorder %s469_s30, %s469_s30 }
  0x40   : > { %p2200_p9 = scmp.lt.s32.totalorder %s2191_s10, %s2191_s10 }
  0x41   : > { %p2194_p2 = pnand %p2192_p0, %p2505_p7 }
  0x42   : > { %1975 = dma.hbm_to_vmem [thread:$0]  (!%p2499_p6), %s2864_s5, 256, %s443_s24, [#allocation8], %s2357_s27, %s2357_s27, %s2358_s13  }
  0x43   : > { %p2195_p5 = pneg %p2194_p2  ;;  %p2201_p10 = por %p2200_p9, %p2199_p8 }
  0x45   : > { %p2202_p11 = pnand %p2201_p10, %p2195_p5 }
  0x47   : > { %2205 = shalt.err (!%p2202_p11)
}
  0x48   : > { %s2865_s7 = sld [smem:[#allocation27_spill]]  ;;  %s2217_s17 = scalar_lea.vmem %s483_s6, 16 }
  0x49   : > { %p2218_p3 = scmp.ne.s32.totalorder %s483_s6, %s2217_s17  ;;  %s2224_s10 = scalar_lea.vmem %s483_s6, 32 }
  0x4a   : > { %p2225_p12 = scmp.lt.s32.totalorder %s483_s6, %s483_s6  ;;  %p2226_p13 = scmp.lt.s32.totalorder %s2224_s10, %s2217_s17 }
  0x4b   : > { %p2220_p4 = pnand %p2218_p3, %p2505_p7 }
  0x4c   : > { %p2227_p0 = por %p2226_p13, %p2225_p12 }
  0x4d   : > { %p2221_p1 = pneg %p2220_p4 }
  0x4e   : > { %1981 = dma.hbm_to_vmem [thread:$0]  (!%p2499_p6), %s2865_s7, 256, %s469_s30, [#allocation11], %s2357_s27, %s2357_s27, %s2358_s13  }
  0x4f   : > { %p2228_p2 = pnand %p2227_p0, %p2221_p1 }
  0x51   : > { %2231 = shalt.err (!%p2228_p2)
}
  0x52   : > { %s2866_s8 = sld [smem:[#allocation28_spill]]  ;;  %s1748_s13 = sadd.s32 4294967294, %s2352_s23  }
  0x53   : > { %s46_s15 = sadd.s32 1, %s2348_s22  ;;  %s81_s29 = sadd.s32 1, %s2340_s20 }
  0x54   : > { %p48_p7 = scmp.ge.s32.totalorder %s46_s15, 2  ;;  %p88_p5 = scmp.ne.s32.totalorder %s2340_s20, %s2336_s19 }
  0x55   : > { %p89_p8 = scmp.eq.s32.totalorder %s2352_s23, 0  ;;  %p94_p9 = scmp.ne.s32.totalorder %s2336_s19, %s2332_s18 }
  0x56   : > { %s2890_s15 = smov (%p48_p7, %s46_s15), 0  ;;  %p2869_p11 = scmp.ne.s32.totalorder %s2858_s25, 0 }
  0x57   : > { %2867 = sst [smem:[#allocation22_spill]] %s2890_s15  ;;  %p2563_p10 = por %p89_p8, %p88_p5 }
  0x58   : > { %1984 = dma.hbm_to_vmem [thread:$0]  (!%p2499_p6), %s2866_s8, 16, %s483_s6, [#allocation14]  }
  0x59   : > { %p2569_p6 = por %p2869_p11, %p94_p9  ;;  %s78_s30 = ssub.s32 %s2348_s22, %s2890_s15 }
  0x5a   : > { %s2871_s28 = sadd.s32 4294967295, %s2352_s23   ;;  %p79_p4 = scmp.eq.s32.totalorder %s78_s30, 0 }
  0x5b   : > { %p398_p3 = scmp.eq.s32.totalorder %s2871_s28, 1  ;;  %p404_p1 = scmp.eq.s32.totalorder %s1748_s13, 1 }
  0x5c   : > { %p1998_p13 = scmp.lt.s32.totalorder %s2352_s23, 2  ;;  %s521_s10 = sand.u32 1, %s2340_s20  }
  0x5d   : > { %p2577_p12 = por %p398_p3, %p88_p5  ;;  %p2585_p0 = por %p404_p1, %p94_p9 }
  0x5e   : > { %s2583_s24 = scalar_select %p79_p4, %s2340_s20, %s81_s29  }
  0x5f   : > { %s1756_s14 = sshll.u32 %s521_s10, 2  ;;  %s1757_s16 = sshll.u32 %s2348_s22, 6 }
  0x60   : > { %2873 = sst [smem:[#allocation23_spill]] %s2583_s24  ;;  %s530_s28 = scalar_lea.hbm %s2826_s1, %s1757_s16 }
  0x61   : > { %s525_s30 = scalar_lea.vmem [#allocation4], %s1756_s14  ;;  %p2596_p2 = pnand %p1998_p13, %p2563_p10 }
  0x62   : > { %s532_s13 = sshll.u32 %s525_s30, 4  ;;  %s522_s29 = scalar_lea.sflag [#allocation5], %s521_s10  ;;  %s533_s13 = int_to_ptr.vmem [resolvable:$true] %s532_s13 }
  0x63   : > { %p2234_p7 = pneg %p2596_p2  ;;  %s2245_s15 = scalar_lea.vmem %s533_s13, 64 }
  0x64   : > { %p2246_p5 = scmp.ne.s32.totalorder %s533_s13, %s2245_s15  ;;  %s2361_s22 = smov [#allocation4]  }
  0x65   : > { %s2250_s24 = sshll.u32 %s2361_s22, 4  ;;  %s2251_s24 = int_to_ptr.vmem [resolvable:$false] %s2250_s24 }
  0x66   : > { %p2248_p8 = pnand %p2246_p5, %p2234_p7  ;;  %s2252_s5 = scalar_lea.vmem %s2251_s24, 128 }
  0x67   : > { %p2253_p11 = scmp.lt.s32.totalorder %s533_s13, %s2251_s24  ;;  %p2254_p3 = scmp.lt.s32.totalorder %s2252_s5, %s2245_s15 }
  0x68   : > { %p2249_p9 = pneg %p2248_p8 }
  0x69   : > { %p2255_p4 = por %p2254_p3, %p2253_p11 }
  0x6b   : > { %p2256_p1 = pnand %p2255_p4, %p2249_p9 }
  0x6d   : > { %2259 = shalt.err (!%p2256_p1)
}
  0x6e   : > { %1988 = dma.hbm_to_vmem [thread:$0]  (!%p2596_p2), %s530_s28, 64, %s533_s13, %s522_s29  }
  0x6f   : > { %p2876_p10 = scmp.ne.s32.totalorder %s2859_s26, 0 }
  0x70   : > { %s2607_s7 = sand.u32 (!%p2876_p10), 1, %s2336_s19  }
  0x71   : > { %541 = sbr.rel (%p2876_p10) target bundleno = 2526 (0x9de), region = 80  ;;  %s1759_s22 = sshll.u32 (!%p2876_p10), %s2607_s7, 2 }
  0x72   : > { %s544_s27 = scalar_lea.sflag (!%p2876_p10), [#allocation5], %s2607_s7  ;;  %s547_s10 = scalar_lea.vmem (!%p2876_p10), [#allocation4], %s1759_s22 }
  0x76   : > { %2311 = dma.done.wait (%p2569_p6), %s544_s27, 64  }
  0x77   : > { %2313 = vsyncadd (%p2569_p6), %s544_s27, 4294967232  ;;  %p2877_p13 = scmp.ne.s32.totalorder %s2858_s25, 0 }
  0x79   : > { %2315 = dma.done.wait (%p2877_p13), [#allocation8], 384  }
  0x7a   : > { %2317 = vsyncadd (%p2877_p13), [#allocation8], 4294966912 }
  0x7b   : > { %2319 = dma.done.wait (%p2877_p13), [#allocation11], 512  }
  0x7c   : > { %2321 = vsyncadd (%p2877_p13), [#allocation11], 4294966784 }
  0x7d   : > { %2323 = dma.done.wait (%p2877_p13), [#allocation14], 16  }
  0x7e   : > { %2325 = vsyncadd (%p2877_p13), [#allocation14], 4294967280  ;;  %v2362_v0 = vmov 0.0   ;;  %vm2363_vm0 = vmmov 0   ;;  %p621_p6 = scmp.lt.s32.totalorder %s2344_s21, 1  ;;  %v2068_v1 = vld [vmem:[%s2829_s4 + $0x8] sm:$0xff]  }
  0x7f   : > { %1845 = vmatprep.subr.bf16.mxu0 %v2362_v0  ;;  %1849 = vmatprep.mubr.msk.bf16.mxu0 %vm2363_vm0, %v2362_v0  ;;  %v2069_v2 = vld [vmem:[%s2829_s4] sm:$0xff]   ;;  %vm650_vm1 = vcmask 261120   ;;  %v2070_v4 = vld [vmem:[%s2828_s3 + $0x8] sm:$0xff]   ;;  %v2072_v8 = vld [vmem:[#allocation9 + $0x8] sm:$0xff]   ;;  %vm752_vm2 = vcmask 60416   ;;  %s2364_s22 = smov 104  }
  0x80   : > { %1853 = vmatprep.subr.bf16.mxu1 %v2362_v0  ;;  %1857 = vmatprep.mubr.msk.bf16.mxu1 %vm2363_vm0, %v2362_v0  ;;  %s622_s8 = scalar_select %p621_p6, %s2344_s21, 1  ;;  %v633_v3 = vld [vmem:[%s547_s10] sm:$0xf]  ;;  %v2073_v9 = vld [vmem:[#allocation9] sm:$0xff]   ;;  %vm856_vm3 = vcmask 64512   ;;  %vm919_vm4 = vcmask 1043456  }
  0x81   : > { %1846 = vmatpush3.bf16.msra.mxu0 %v2068_v1  ;;  %v2071_v5 = vld [vmem:[%s2828_s3] sm:$0xff]   ;;  %1854 = vmatpush3.bf16.msra.mxu1 %v2072_v8  ;;  %s2365_s27 = smov 120   ;;  %s2366_s10 = smov 112   ;;  %v793_v41 = vld [vmem:[#allocation7] sm:$0xff]  ;;  %vm1310_vm5 = vcmask 130048   ;;  %vm1313_vm6 = vcmask 195584  }
  0x82   : > { %s1766_s24 = sshll.u32 %s622_s8, 3  ;;  %1847 = vmatprep.subr.bf16.mxu0 %v2362_v0  ;;  %1855 = vmatprep.subr.bf16.mxu1 %v2362_v0  ;;  %s2367_s8 = smov 8   ;;  %vm1513_vm7 = vcmask 523264  }
  0x83   : > { %s627_s13 = scalar_lea.vmem %s2825_s0, %s1766_s24  ;;  %s2368_s26 = smov 16  }
  0x84   : > { %v2652_v6 = vld [vmem:[%s627_s13] sm:$0xff]  ;;  %s2369_s15 = smov 24   ;;  %s2879_s24 = sld [smem:[#allocation30_spill]] }
  0x85   : > { %1848 = vmatpush3.bf16.msra.mxu0 %v2069_v2  ;;  %v792_v7 = vpack.c.bf16 %v2652_v6, %v2652_v6  ;;  %1856 = vmatpush3.bf16.msra.mxu1 %v2073_v9  ;;  %s2880_s28 = sld [smem:[#allocation31_spill]]  ;;  %s1804_s30 = sshll.u32 %s2344_s21, 7 }
  0x86   : > { %1861 = vmatprep.subr.bf16.mxu0 %v2362_v0  ;;  %1869 = vmatprep.subr.bf16.mxu1 %v2362_v0  ;;  %s2370_s25 = smov [#allocation15]  }
  0x87   : > { %s2264_s6 = sshll.u32 %s2370_s25, 4  ;;  %s2265_s6 = int_to_ptr.vmem [resolvable:$false] %s2264_s6 }
  0x88   : > { %1850 = vmatmul.mubr.msk.bf16.vlgmr.msra.gmra.mxu0 %vm650_vm1, %v633_v3  ;;  %1858 = vmatmul.mubr.msk.bf16.vlgmr.msra.gmra.mxu1 %vm650_vm1, %v633_v3  ;;  %s2266_s21 = scalar_lea.vmem %s2265_s6, 256 }
  0x89   : > { %1862 = vmatpush3.bf16.msra.mxu0 %v2070_v4  ;;  %1865 = vmatprep.mubr.msk.bf16.mxu0 %vm2363_vm0, %v2362_v0 }
  0x8a   : > { %1863 = vmatprep.subr.bf16.mxu0 %v2362_v0  ;;  %1871 = vmatprep.mubr.msk.bf16.mxu1 %vm2363_vm0, %v2362_v0 }
  0x8d   : > { %1864 = vmatpush3.bf16.msra.mxu0 %v2071_v5 }
  0x8e   : > { %1875 = vmatprep.subr.bf16.mxu0 %v2362_v0 }
  0x90   : > { %1866 = vmatmul.mubr.msk.bf16.vlgmr.msra.gmra.mxu0 %vm650_vm1, %v792_v7 }
  0x91   : > { %1877 = vmatprep.mubr.msk.bf16.mxu0 %vm2363_vm0, %v2362_v0 }
 0x148   : > { %v688_v10 = vpop.f32.mrf.mxu0  ;;  %v745_v22 = vpop.f32.mrf.mxu1 }
 0x149   : > { %v694_v11 = vpack.c.bf16 %v688_v10, %v688_v10  ;;  %v2681_v23 = vpack.c.bf16 %v745_v22, %v745_v22 }
 0x14a   : > { %v1851_v12 = vpop.f32.mrf.mxu0  ;;  %v1859_v24 = vpop.f32.mrf.mxu1 }
 0x14b   : > { %753 = vst.msk [vmem:[#allocation2] sm:$0xf] %vm752_vm2, %v694_v11  ;;  %781 = vrot.lane.b32.xlu1 %v694_v11, %s2364_s22  ;;  %758 = vrot.lane.b32.xlu0 %v694_v11, %s2365_s27  ;;  %754 = vst.msk [vmem:[#allocation3] sm:$0xf] %vm752_vm2, %v2681_v23 }
 0x14c   : > { %v691_v13 = vpop.f32.mrf.mxu0  ;;  %v748_v25 = vpop.f32.mrf.mxu1 }
 0x14e   : > { %v1852_v14 = vpop.f32.mrf.mxu0  ;;  %v1860_v26 = vpop.f32.mrf.mxu1 }
 0x14f   : > { %771 = vrot.lane.b32.xlu0 %v694_v11, %s2366_s10 }
 0x150   : > { %v848_v15 = vpop.f32.mrf.mxu0 }
 0x151   : > { %v854_v16 = vpack.c.bf16 %v848_v15, %v848_v15 }
 0x152   : > { %v1867_v17 = vpop.f32.mrf.mxu0  ;;  %v855_v18 = vld [vmem:[#allocation2] sm:$0xf]  ;;  %v915_v27 = vld [vmem:[#allocation3] sm:$0xf] }
 0x153   : > { %v861_v19 = vsel %vm856_vm3, %v855_v18, 0  ;;  %967 = vrot.lane.b32.xlu1 %v854_v16, %s2365_s27  ;;  %1078 = vrot.lane.b32.xlu0 %v854_v16, %s2366_s10  ;;  %v921_v28 = vsel %vm919_vm4, %v915_v27, 0 }
 0x154   : > { %1870 = vmatpush3.bf16.xpose.msra.mxu1 %v861_v19  ;;  %v851_v20 = vpop.f32.mrf.mxu0  ;;  %1876 = vmatpush3.bf16.msra.mxu0 %v921_v28 }
 0x155   : > { %1881 = vmatprep.subr.bf16.mxu1 %v2362_v0  ;;  %1887 = vmatprep.subr.bf16.mxu0 %v2362_v0 }
 0x156   : > { %v1868_v21 = vpop.f32.mrf.mxu0 }
 0x157   : > { %1189 = vrot.lane.b32.xlu1 %v854_v16, %s2364_s22 }
 0x15b   : > { %1872 = vmatmul.mubr.msk.bf16.vlgmr.msra.gmra.mxu1 %vm856_vm3, %v854_v16 }
 0x15c   : > { %1883 = vmatprep.mubr.msk.bf16.mxu1 %vm2363_vm0, %v2362_v0 }
 0x1bd   : > { %v782_v29 = vpop.permute.xlu1 %781  ;;  %v759_v30 = vpop.permute.xlu0 %758 }
 0x1be   : > { %785 = vst.msk [vmem:[#allocation2 + $0xc] sm:$0xf] %vm752_vm2, %v782_v29  ;;  %762 = vst.msk [vmem:[#allocation2 + $0x4] sm:$0xf] %vm752_vm2, %v759_v30 }
 0x1c1   : > { %v772_v31 = vpop.permute.xlu0 %771 }
 0x1c2   : > { %775 = vst.msk [vmem:[#allocation2 + $0x8] sm:$0xf] %vm752_vm2, %v772_v31 }
 0x1c5   : > { %v965_v32 = vld [vmem:[#allocation2 + $0x4] sm:$0xf]  ;;  %v968_v35 = vpop.permute.xlu1 %967  ;;  %v1188_v37 = vld [vmem:[#allocation2 + $0xc] sm:$0xf]  ;;  %v1079_v38 = vpop.permute.xlu0 %1078 }
 0x1c6   : > { %v973_v33 = vsel %vm856_vm3, %v965_v32, 0  ;;  %v1195_v39 = vsel %vm856_vm3, %v1188_v37, 0 }
 0x1c7   : > { %1882 = vmatpush3.bf16.xpose.msra.mxu1 %v973_v33 }
 0x1c8   : > { %1893 = vmatprep.subr.bf16.mxu1 %v2362_v0 }
 0x1c9   : > { %v1077_v34 = vld [vmem:[#allocation2 + $0x8] sm:$0xf]  ;;  %v1190_v40 = vpop.permute.xlu1 %1189 }
 0x1ca   : > { %v1084_v36 = vsel %vm856_vm3, %v1077_v34, 0 }
 0x1ce   : > { %1884 = vmatmul.mubr.msk.bf16.vlgmr.msra.gmra.mxu1 %vm856_vm3, %v968_v35 }
 0x1cf   : > { %1894 = vmatpush3.bf16.xpose.msra.mxu1 %v1084_v36  ;;  %1895 = vmatprep.mubr.msk.bf16.mxu1 %vm2363_vm0, %v2362_v0 }
 0x1d0   : > { %1905 = vmatprep.subr.bf16.mxu1 %v2362_v0 }
 0x1d6   : > { %1896 = vmatmul.mubr.msk.bf16.vlgmr.msra.gmra.mxu1 %vm856_vm3, %v1079_v38 }
 0x1d7   : > { %1906 = vmatpush3.bf16.xpose.msra.mxu1 %v1195_v39  ;;  %1907 = vmatprep.mubr.msk.bf16.mxu1 %vm2363_vm0, %v2362_v0 }
 0x1d8   : > { %1917 = vmatprep.subr.bf16.mxu1 %v2362_v0 }
 0x1de   : > { %1908 = vmatmul.mubr.msk.bf16.vlgmr.msra.gmra.mxu1 %vm856_vm3, %v1190_v40 }
 0x1df   : > { %1921 = vmatprep.mubr.msk.bf16.mxu1 %vm2363_vm0, %v2362_v0 }
 0x21b   : > { %v897_v42 = vpop.f32.mrf.mxu1 }
 0x21c   : > { %v898_v43 = vadd.f32 %v897_v42, %v793_v41 }
 0x21d   : > { %v1873_v44 = vpop.f32.mrf.mxu1 }
 0x21e   : > { %v903_v45 = vsel %vm856_vm3, %v898_v43, -inf }
 0x21f   : > { %904 = vmax.xlane.f32.xlu0 %v903_v45  ;;  %v900_v46 = vpop.f32.mrf.mxu1 }
 0x221   : > { %v1874_v47 = vpop.f32.mrf.mxu1 }
 0x28e   : > { %v1009_v48 = vpop.f32.mrf.mxu1 }
 0x28f   : > { %v1010_v49 = vadd.f32 %v1009_v48, %v793_v41 }
 0x290   : > { %v1885_v50 = vpop.f32.mrf.mxu1 }
 0x291   : > { %v1015_v51 = vsel %vm856_vm3, %v1010_v49, -inf }
 0x292   : > { %1016 = vmax.xlane.f32.xlu1 %v1015_v51  ;;  %v1012_v52 = vpop.f32.mrf.mxu1 }
 0x294   : > { %v1886_v53 = vpop.f32.mrf.mxu1 }
 0x296   : > { %v1120_v54 = vpop.f32.mrf.mxu1 }
 0x297   : > { %v1121_v55 = vadd.f32 %v1120_v54, %v793_v41 }
 0x298   : > { %v1897_v56 = vpop.f32.mrf.mxu1 }
 0x299   : > { %v1126_v57 = vsel %vm856_vm3, %v1121_v55, -inf }
 0x29a   : > { %1127 = vmax.xlane.f32.xlu0 %v1126_v57  ;;  %v1123_v58 = vpop.f32.mrf.mxu1  ;;  %v2074_v57 = vld [vmem:[#allocation10 + $0x8] sm:$0xff]  }
 0x29b   : > { %1918 = vmatpush3.bf16.msra.mxu1 %v2074_v57 }
 0x29c   : > { %v1898_v59 = vpop.f32.mrf.mxu1  ;;  %1919 = vmatprep.subr.bf16.mxu1 %v2362_v0 }
 0x29d   : > { %v2075_v59 = vld [vmem:[#allocation10] sm:$0xff]  }
 0x29e   : > { %v1231_v60 = vpop.f32.mrf.mxu1 }
 0x29f   : > { %v1232_v61 = vadd.f32 %v1231_v60, %v793_v41  ;;  %1920 = vmatpush3.bf16.msra.mxu1 %v2075_v59 }
 0x2a0   : > { %v1909_v62 = vpop.f32.mrf.mxu1  ;;  %1933 = vmatprep.subr.bf16.mxu1 %v2362_v0 }
 0x2a1   : > { %v1237_v63 = vsel %vm856_vm3, %v1232_v61, -inf }
 0x2a2   : > { %1238 = vmax.xlane.f32.xlu0 %v1237_v63  ;;  %v1234_v1 = vpop.f32.mrf.mxu1 }
 0x2a4   : > { %v1910_v2 = vpop.f32.mrf.mxu1 }
 0x2a8   : > { %v905_v3 = vpop.xlane.xlu0 %904 }
 0x2a9   : > { %v906_v4 = vsub.f32 %v898_v43, %v905_v3 }
 0x2ab   : > { %v907_v5 = vmul.f32 1.442695, %v906_v4 }
 0x2ad   : > { %2082 = vpow2.f32 %v907_v5 }
 0x2ba   : > { %v2083_v7 = vpop.eup %2082 }
 0x2bb   : > { %v909_v8 = vsel %vm856_vm3, %v2083_v7, 0.0 }
 0x2bc   : > { %910 = vadd.xlane.f32.xlu1 %v909_v8 }
 0x2cd   : > { %766 = vrot.lane.b32.xlu1 %v2681_v23, %s2365_s27  ;;  %s2881_s27 = sld [smem:[#allocation32_spill]] }
 0x31b   : > { %v1017_v9 = vpop.xlane.xlu1 %1016 }
 0x31c   : > { %v1018_v10 = vsub.f32 %v1010_v49, %v1017_v9 }
 0x31e   : > { %v1019_v11 = vmul.f32 1.442695, %v1018_v10 }
 0x320   : > { %2084 = vpow2.f32 %v1019_v11 }
 0x323   : > { %v1128_v12 = vpop.xlane.xlu0 %1127 }
 0x324   : > { %v1129_v13 = vsub.f32 %v1121_v55, %v1128_v12 }
 0x326   : > { %v1130_v14 = vmul.f32 1.442695, %v1129_v13 }
 0x328   : > { %2086 = vpow2.f32 %v1130_v14 }
 0x32b   : > { %v1239_v15 = vpop.xlane.xlu0 %1238 }
 0x32c   : > { %v1240_v16 = vsub.f32 %v1232_v61, %v1239_v15 }
 0x32d   : > { %v2085_v17 = vpop.eup %2084 }
 0x32e   : > { %v1241_v18 = vmul.f32 1.442695, %v1240_v16  ;;  %v1021_v19 = vsel %vm856_vm3, %v2085_v17, 0.0 }
 0x32f   : > { %1022 = vadd.xlane.f32.xlu0 %v1021_v19 }
 0x330   : > { %2088 = vpow2.f32 %v1241_v18 }
 0x335   : > { %v2087_v20 = vpop.eup %2086 }
 0x336   : > { %v1132_v21 = vsel %vm856_vm3, %v2087_v20, 0.0 }
 0x337   : > { %1133 = vadd.xlane.f32.xlu1 %v1132_v21 }
 0x33d   : > { %v2089_v22 = vpop.eup %2088 }
 0x33e   : > { %v1243_v24 = vsel %vm856_vm3, %v2089_v22, 0.0 }
 0x33f   : > { %1244 = vadd.xlane.f32.xlu0 %v1243_v24 }
 0x345   : > { %v911_v25 = vpop.xlane.xlu1 %910 }
 0x346   : > { %2090 = vrcp.f32 %v911_v25 }
 0x348   : > { %786 = vrot.lane.b32.xlu1 %v2681_v23, %s2364_s22 }
 0x349   : > { %v767_v26 = vpop.permute.xlu1 %766 }
 0x34a   : > { %770 = vst.msk [vmem:[#allocation3 + $0x4] sm:$0xf] %vm752_vm2, %v767_v26 }
 0x351   : > { %v1028_v29 = vld [vmem:[#allocation3 + $0x4] sm:$0xf] }
 0x352   : > { %v1033_v31 = vsel %vm919_vm4, %v1028_v29, 0  ;;  %v2079_v29 = vld [vmem:[%s2834_s9 + $0x10] sm:$0xff]  }
 0x353   : > { %v2091_v27 = vpop.eup %2090 }
 0x354   : > { %v913_v28 = vmul.f32 %v2091_v27, %v2083_v7  ;;  %v2076_v27 = vld [vmem:[#allocation12 + $0x8] sm:$0xff]  }
 0x355   : > { %776 = vrot.lane.b32.xlu0 %v2681_v23, %s2366_s10  ;;  %s1601_s10 = scalar_lea.hbm %s2881_s27, %s1804_s30 }
 0x356   : > { %v914_v30 = vpack.c.bf16 %v913_v28, %v913_v28  ;;  %v2077_v28 = vld [vmem:[#allocation12] sm:$0xff]  }
 0x358   : > { %1878 = vmatmul.mubr.msk.bf16.vlgmr.msra.gmra.mxu0 %vm856_vm3, %v914_v30 }
 0x359   : > { %1888 = vmatpush3.bf16.msra.mxu0 %v1033_v31  ;;  %1889 = vmatprep.mubr.msk.bf16.mxu0 %vm2363_vm0, %v2362_v0 }
 0x35a   : > { %1899 = vmatprep.subr.bf16.mxu0 %v2362_v0 }
 0x3b8   : > { %v1023_v32 = vpop.xlane.xlu0 %1022 }
 0x3b9   : > { %2092 = vrcp.f32 %v1023_v32 }
 0x3c0   : > { %v1134_v33 = vpop.xlane.xlu1 %1133 }
 0x3c1   : > { %2094 = vrcp.f32 %v1134_v33 }
 0x3c4   : > { %v787_v34 = vpop.permute.xlu1 %786 }
 0x3c5   : > { %790 = vst.msk [vmem:[#allocation3 + $0xc] sm:$0xf] %vm752_vm2, %v787_v34  ;;  %v1789_v34 = vld [vmem:[%s2836_s11] ss:$0 sm:$0xff] }
 0x3c6   : > { %v2093_v23 = vpop.eup %2092 }
 0x3c7   : > { %v1025_v35 = vmul.f32 %v2093_v23, %v2085_v17 }
 0x3c8   : > { %v1245_v36 = vpop.xlane.xlu0 %1244 }
 0x3c9   : > { %v1026_v37 = vpack.c.bf16 %v1025_v35, %v1025_v35  ;;  %2096 = vrcp.f32 %v1245_v36  ;;  %v1790_v35 = vld [vmem:[%s2837_s12] ss:$0 sm:$0xff] }
 0x3cb   : > { %1890 = vmatmul.mubr.msk.bf16.vlgmr.msra.gmra.mxu0 %vm856_vm3, %v1026_v37 }
 0x3cc   : > { %v777_v38 = vpop.permute.xlu0 %776  ;;  %1901 = vmatprep.mubr.msk.bf16.mxu0 %vm2363_vm0, %v2362_v0  ;;  %v1250_v43 = vld [vmem:[#allocation3 + $0xc] sm:$0xf] }
 0x3cd   : > { %780 = vst.msk [vmem:[#allocation3 + $0x8] sm:$0xf] %vm752_vm2, %v777_v38  ;;  %v1255_v46 = vsel %vm919_vm4, %v1250_v43, 0 }
 0x3ce   : > { %v2095_v39 = vpop.eup %2094 }
 0x3cf   : > { %v1136_v40 = vmul.f32 %v2095_v39, %v2087_v20  ;;  %v2080_v39 = vld [vmem:[%s2834_s9 + $0x8] sm:$0xff]  }
 0x3d1   : > { %v1137_v44 = vpack.c.bf16 %v1136_v40, %v1136_v40  ;;  %v2081_v40 = vld [vmem:[%s2834_s9] sm:$0xff]  }
 0x3d4   : > { %v1139_v41 = vld [vmem:[#allocation3 + $0x8] sm:$0xf] }
 0x3d5   : > { %v1144_v42 = vsel %vm919_vm4, %v1139_v41, 0  ;;  %v1791_v41 = vld [vmem:[#allocation13] ss:$0 sm:$0xff] }
 0x3d6   : > { %1900 = vmatpush3.bf16.msra.mxu0 %v1144_v42  ;;  %v2097_v45 = vpop.eup %2096 }
 0x3d7   : > { %1911 = vmatprep.subr.bf16.mxu0 %v2362_v0  ;;  %v1247_v47 = vmul.f32 %v2097_v45, %v2089_v22 }
 0x3d9   : > { %1902 = vmatmul.mubr.msk.bf16.vlgmr.msra.gmra.mxu0 %vm856_vm3, %v1137_v44  ;;  %v1248_v48 = vpack.c.bf16 %v1247_v47, %v1247_v47 }
 0x3da   : > { %1912 = vmatpush3.bf16.msra.mxu0 %v1255_v46  ;;  %1913 = vmatprep.mubr.msk.bf16.mxu0 %vm2363_vm0, %v2362_v0 }
 0x3db   : > { %1925 = vmatprep.subr.bf16.mxu0 %v2362_v0 }
 0x3e1   : > { %1914 = vmatmul.mubr.msk.bf16.vlgmr.msra.gmra.mxu0 %vm856_vm3, %v1248_v48 }
 0x3e2   : > { %1929 = vmatprep.mubr.msk.bf16.mxu0 %vm2363_vm0, %v2362_v0  ;;  %1926 = vmatpush3.bf16.msra.mxu0 %v2076_v27 }
 0x3e3   : > { %1927 = vmatprep.subr.bf16.mxu0 %v2362_v0 }
 0x3e6   : > { %1928 = vmatpush3.bf16.msra.mxu0 %v2077_v28 }
 0x418   : > { %v957_v49 = vpop.f32.mrf.mxu0 }
 0x419   : > { %v963_v9 = vpack.c.bf16 %v957_v49, %v957_v49 }
 0x41a   : > { %v1879_v50 = vpop.f32.mrf.mxu0 }
 0x41c   : > { %v960_v51 = vpop.f32.mrf.mxu0 }
 0x41e   : > { %v1880_v52 = vpop.f32.mrf.mxu0 }
 0x48b   : > { %v1069_v53 = vpop.f32.mrf.mxu0 }
 0x48c   : > { %v1075_v54 = vpack.c.bf16 %v1069_v53, %v1069_v53 }
 0x48d   : > { %v1891_v55 = vpop.f32.mrf.mxu0 }
 0x48e   : > { %1299 = vrot.lane.b32.xlu1 %v1075_v54, %s2367_s8  ;;  %s1589_s8 = scalar_lea.sflag [#allocation6], %s2607_s7 }
 0x48f   : > { %v1072_v56 = vpop.f32.mrf.mxu0 }
 0x491   : > { %v1892_v58 = vpop.f32.mrf.mxu0 }
 0x499   : > { %v1180_v60 = vpop.f32.mrf.mxu0 }
 0x49a   : > { %v1186_v61 = vpack.c.bf16 %v1180_v60, %v1180_v60 }
 0x49b   : > { %v1903_v62 = vpop.f32.mrf.mxu0 }
 0x49c   : > { %1302 = vrot.lane.b32.xlu0 %v1186_v61, %s2368_s26  ;;  %s2878_s26 = sld [smem:[#allocation29_spill]] }
 0x49d   : > { %v1183_v63 = vpop.f32.mrf.mxu0 }
 0x49f   : > { %v1904_v1 = vpop.f32.mrf.mxu0 }
 0x4a1   : > { %v1291_v2 = vpop.f32.mrf.mxu0 }
 0x4a2   : > { %v1297_v3 = vpack.c.bf16 %v1291_v2, %v1291_v2  ;;  %v1795_v49 = vld [vmem:[%s2878_s26] ss:$0 sm:$0xff] }
 0x4a3   : > { %v1915_v4 = vpop.f32.mrf.mxu0  ;;  %v1801_v2 = vld [vmem:[%s2879_s24] ss:$0 sm:$0xff] }
 0x4a4   : > { %1305 = vrot.lane.b32.xlu1 %v1297_v3, %s2369_s15  ;;  %s1765_s15 = sshll.u32 %s2607_s7, 3  ;;  %v1802_v4 = vld [vmem:[%s2880_s28] ss:$0 sm:$0xff] }
 0x4a5   : > { %v1294_v5 = vpop.f32.mrf.mxu0  ;;  %s620_s13 = scalar_lea.vmem [#allocation15], %s1765_s15 }
 0x4a6   : > { %s1603_s29 = sshll.u32 %s620_s13, 4  ;;  %s1604_s29 = int_to_ptr.vmem [resolvable:$true] %s1603_s29 }
 0x4a7   : > { %v1916_v7 = vpop.f32.mrf.mxu0  ;;  %s2260_s26 = scalar_lea.vmem %s1604_s29, 128  ;;  %p2267_p8 = scmp.lt.s32.totalorder %s1604_s29, %s2265_s6 }
 0x4a8   : > { %p2261_p2 = scmp.ne.s32.totalorder %s1604_s29, %s2260_s26  ;;  %p2268_p9 = scmp.lt.s32.totalorder %s2266_s21, %s2260_s26 }
 0x4aa   : > { %p2262_p7 = pnand %p2261_p2, %p2577_p12  ;;  %p2269_p11 = por %p2268_p9, %p2267_p8 }
 0x4ac   : > { %p2263_p5 = pneg %p2262_p7 }
 0x4ae   : > { %p2270_p3 = pnand %p2269_p11, %p2263_p5 }
 0x500   : > { %v1300_v8 = vpop.permute.xlu1 %1299 }
 0x501   : > { %v1309_v11 = vsel %vm856_vm3, %v963_v9, %v1300_v8 }
 0x50e   : > { %v1303_v10 = vpop.permute.xlu0 %1302 }
 0x50f   : > { %v1312_v12 = vsel %vm1310_vm5, %v1309_v11, %v1303_v10 }
 0x516   : > { %v1306_v13 = vpop.permute.xlu1 %1305 }
 0x517   : > { %v1315_v14 = vsel %vm1313_vm6, %v1312_v12, %v1306_v13 }
 0x518   : > { %1922 = vmatmul.mubr.msk.bf16.vlgmr.msra.gmra.mxu1 %vm650_vm1, %v1315_v14 }
 0x519   : > { %1941 = vmatprep.mubr.msk.bf16.mxu1 %vm2363_vm0, %v2362_v0 }
 0x5d8   : > { %v1368_v15 = vpop.f32.mrf.mxu1 }
 0x5d9   : > { %v1374_v16 = vadd.f32 %v1368_v15, %v2652_v6  ;;  %v2078_v6 = vld [vmem:[%s2834_s9 + $0x18] sm:$0xff]  }
 0x5da   : > { %v1923_v17 = vpop.f32.mrf.mxu1  ;;  %1934 = vmatpush3.bf16.msra.mxu1 %v2078_v6 }
 0x5db   : > { %v1377_v18 = vsel %vm650_vm1, %v1374_v16, 0.0  ;;  %1935 = vmatprep.subr.bf16.mxu1 %v2362_v0 }
 0x5dc   : > { %1378 = vadd.xlane.f32.xlu0 %v1377_v18  ;;  %v1371_v19 = vpop.f32.mrf.mxu1 }
 0x5de   : > { %v1924_v20 = vpop.f32.mrf.mxu1  ;;  %1936 = vmatpush3.bf16.msra.mxu1 %v2079_v29 }
 0x5df   : > { %1937 = vmatprep.subr.bf16.mxu1 %v2362_v0 }
 0x5e2   : > { %1938 = vmatpush3.bf16.msra.mxu1 %v2080_v39 }
 0x5e3   : > { %1939 = vmatprep.subr.bf16.mxu1 %v2362_v0 }
 0x5e6   : > { %1940 = vmatpush3.bf16.msra.mxu1 %v2081_v40 }
 0x665   : > { %v1379_v21 = vpop.xlane.xlu0 %1378 }
 0x666   : > { %v1381_v22 = vmul.f32 0.03125, %v1379_v21 }
 0x668   : > { %v1382_v24 = vsub.f32 %v1374_v16, %v1381_v22 }
 0x66a   : > { %v1383_v25 = vmul.f32 %v1382_v24, %v1382_v24 }
 0x66c   : > { %v1384_v26 = vsel %vm650_vm1, %v1383_v25, 0.0 }
 0x66d   : > { %1385 = vadd.xlane.f32.xlu1 %v1384_v26 }
 0x6f6   : > { %v1386_v30 = vpop.xlane.xlu1 %1385 }
 0x6f7   : > { %v1387_v31 = vmul.f32 0.03125, %v1386_v30 }
 0x6f9   : > { %v1388_v32 = vadd.f32 1e-06, %v1387_v31 }
 0x6fb   : > { %2098 = vrsqrt.f32 %v1388_v32 }
 0x708   : > { %v2099_v33 = vpop.eup %2098 }
 0x709   : > { %v1390_v23 = vmul.f32 %v2099_v33, %v1382_v24 }
 0x70b   : > { %v1397_v36 = vmul.f32 %v1789_v34, %v1390_v23 }
 0x70d   : > { %v1404_v37 = vadd.f32 %v1790_v35, %v1397_v36 }
 0x70f   : > { %v1405_v38 = vpack.c.bf16 %v1404_v37, %v1404_v37 }
 0x711   : > { %1930 = vmatmul.mubr.msk.bf16.vlgmr.msra.gmra.mxu0 %vm650_vm1, %v1405_v38 }
 0x7d1   : > { %v1466_v42 = vpop.f32.mrf.mxu0 }
 0x7d2   : > { %v1467_v43 = vadd.f32 %v1791_v41, %v1466_v42 }
 0x7d3   : > { %v1931_v44 = vpop.f32.mrf.mxu0 }
 0x7d4   : > { %v1472_v45 = vmax.f32 %v1467_v43, 0.0 }
 0x7d5   : > { %v1469_v46 = vpop.f32.mrf.mxu0 }
 0x7d6   : > { %v1473_v47 = vpack.c.bf16 %v1472_v45, %v1472_v45 }
 0x7d7   : > { %v1932_v48 = vpop.f32.mrf.mxu0 }
 0x7d8   : > { %1942 = vmatmul.mubr.msk.bf16.vlgmr.msra.gmra.mxu1 %vm1513_vm7, %v1473_v47 }
 0x898   : > { %v1551_v0 = vpop.f32.mrf.mxu1 }
 0x899   : > { %v1552_v50 = vadd.f32 %v1795_v49, %v1551_v0 }
 0x89a   : > { %v1943_v51 = vpop.f32.mrf.mxu1 }
 0x89b   : > { %v1557_v52 = vadd.f32 %v1552_v50, %v1404_v37 }
 0x89c   : > { %v1554_v53 = vpop.f32.mrf.mxu1 }
 0x89d   : > { %v1560_v54 = vsel %vm650_vm1, %v1557_v52, 0.0 }
 0x89e   : > { %1561 = vadd.xlane.f32.xlu0 %v1560_v54  ;;  %v1944_v55 = vpop.f32.mrf.mxu1 }
 0x927   : > { %v1562_v56 = vpop.xlane.xlu0 %1561 }
 0x928   : > { %v1563_v57 = vmul.f32 0.03125, %v1562_v56 }
 0x92a   : > { %v1564_v58 = vsub.f32 %v1557_v52, %v1563_v57 }
 0x92c   : > { %v1565_v59 = vmul.f32 %v1564_v58, %v1564_v58 }
 0x92e   : > { %v1566_v60 = vsel %vm650_vm1, %v1565_v59, 0.0 }
 0x92f   : > { %1567 = vadd.xlane.f32.xlu0 %v1566_v60 }
 0x9b8   : > { %v1568_v61 = vpop.xlane.xlu0 %1567 }
 0x9b9   : > { %v1569_v62 = vmul.f32 0.03125, %v1568_v61 }
 0x9bb   : > { %v1570_v63 = vadd.f32 1e-06, %v1569_v62 }
 0x9bd   : > { %2100 = vrsqrt.f32 %v1570_v63 }
 0x9ca   : > { %v2101_v1 = vpop.eup %2100 }
 0x9cb   : > { %v1572_v3 = vmul.f32 %v2101_v1, %v1564_v58 }
 0x9cd   : > { %v1579_v5 = vmul.f32 %v1801_v2, %v1572_v3 }
 0x9cf   : > { %v1586_v7 = vadd.f32 %v1802_v4, %v1579_v5 }
 0x9d1   : > { %1587 = vst.msk [vmem:[%s620_s13] sm:$0xff] %vm650_vm1, %v1586_v7 }
 0x9d2   : > { %2273 = shalt.err (!%p2270_p3)
}
 0x9d3   : > { %s2274_s15 = scalar_lea.hbm %s1601_s10, 128  ;;  %s2278_s14 = scalar_lea.hbm %s2881_s27, 256 }
 0x9d4   : > { %p2275_p4 = scmp.ne.s32.totalorder %s1601_s10, %s2274_s15  ;;  %p2279_p13 = scmp.lt.s32.totalorder %s1601_s10, %s2881_s27 }
 0x9d5   : > { %p2280_p6 = scmp.lt.s32.totalorder %s2278_s14, %s2274_s15 }
 0x9d6   : > { %p2276_p1 = pnand %p2275_p4, %p2577_p12 }
 0x9d7   : > { %p2281_p2 = por %p2280_p6, %p2279_p13 }
 0x9d8   : > { %p2277_p10 = pneg %p2276_p1 }
 0x9da   : > { %p2282_p7 = pnand %p2281_p2, %p2277_p10 }
 0x9dc   : > { %2285 = shalt.err (!%p2282_p7)
}
 0x9dd   : > { %1967 = dma.vmem_to_hbm [thread:$0]  (%p2577_p12), %s1604_s29, 128, %s1601_s10, %s1589_s8  }
 0x9de PF: > { %s1615_s30 = sand.u32 1, %s2332_s18   ;;  %p2882_p5 = scmp.ge.s32.totalorder %s2352_s23, 2 }
 0x9df   : > { %s1616_s13 = scalar_lea.sflag [#allocation6], %s1615_s30 }
 0x9e0   : > { %p1990_p8 = pnand %p2882_p5, %p2585_p0 }
 0x9e2   : > { %p1991_p9 = pneg %p1990_p8 }
 0x9e4   : > { %2327 = dma.done.wait (%p1991_p9), %s1616_s13, 128  }
 0x9e5   : > { %2329 = vsyncadd (%p1991_p9), %s1616_s13, 4294967168  ;;  %s34_s23 = sadd.s32 1, %s2352_s23   ;;  %s2883_s5 = sld [smem:[#allocation23_spill]] }
 0x9e6   : > { %p31_p11 = scmp.ge.s32.totalorder %s34_s23, 4   ;;  %s2884_s21 = sld [smem:[#allocation21_spill]] }
 0x9e7   : > { %s2885_s22 = sld [smem:[#allocation22_spill]]  ;;  %s2886_s18 = smov %s2336_s19 }
 0x9e8   : > { %s2887_s19 = smov %s2340_s20  ;;  %33 = sbr.rel (!%p31_p11) target bundleno = 19 (0x13), region = 165 }
 0x9eb   : > { %s2888_s20 = smov %s2883_s5 }
 0x9ed   :  { %1621 = vsyncpa [#allocation5], 1 }
 0x9ee   :  { %1623 = vsyncpa [#allocation5 + $0x1], 1 }
 0x9ef   :  { %1624 = vsyncpa [#allocation8], 1 }
 0x9f0   :  { %1625 = vsyncpa [#allocation11], 1 }
 0x9f1   :  { %1626 = vsyncpa [#allocation14], 1 }
 0x9f2   :  { %1627 = vsyncpa [#allocation6], 1 }
 0x9f3   :  { %1629 = vsyncpa [#allocation6 + $0x1], 1 }

</bundles_post_ra>
